<compile_context>
chip_gen: v6e
topology: v6e:2x2x1
jax: 0.10.0
libtpu: 0.0.40
codegen_flags: <defaults>
</compile_context>

<pallas_src>
import functools

import jax
import jax.numpy as jnp
from jax.experimental import pallas as pl
from jax.experimental.pallas import tpu as pltpu


def _post_process_kernel(disp_ref, spg_ref, out_ref, *, scale, maxdisp):
    # disp_ref: (1, C, ht, w)     low-res unfolded disparity candidates (one H tile)
    # spg_ref:  (1, C, ht*s, W)   superpixel-guidance weights (one H tile)
    # out_ref:  (1, ht*s, W)
    _, C, ht, w = disp_ref.shape
    W = spg_ref.shape[3]

    # One-hot nearest-W expansion matrix, pre-scaled by maxdisp, built on the
    # VPU from two 2-D iotas (not a pipelined input -> no extra VMEM/DMA).
    row = jax.lax.broadcasted_iota(jnp.int32, (w, W), 0)
    col = jax.lax.broadcasted_iota(jnp.int32, (w, W), 1)
    left = row * scale
    e_w = jnp.where((col >= left) & (col < left + scale),
                    jnp.float32(maxdisp), jnp.float32(0.0))

    # Channel-weighted sum, unrolled over the small static C.  Matmul inside
    # the loop bounds the live intermediate to one (ht, W) tile per channel.
    acc = None
    for c in range(C):
        # Nearest-W upsample + maxdisp scale in one MXU matmul.
        t_c = jnp.dot(disp_ref[0, c].astype(jnp.float32), e_w,
                      preferred_element_type=jnp.float32,
                      precision=jax.lax.Precision.HIGHEST)          # (ht, W)
        # Nearest-H upsample == sublane relabel of spg + row broadcast of t_c.
        spg_c = spg_ref[0, c].astype(jnp.float32).reshape(ht, scale, W)
        contrib = spg_c * t_c[:, None, :]
        acc = contrib if acc is None else acc + contrib

    out_ref[0] = acc.reshape(ht * scale, W).astype(out_ref.dtype)


def _generation_budgets():
    """Per-generation spg tile budget and scoped-VMEM limit (bytes)."""
    try:
        kind = jax.devices()[0].device_kind.lower()
    except Exception:  # pragma: no cover - defensive
        kind = ""
    vmem_phys = None
    try:
        vmem_phys = int(getattr(pltpu.get_tpu_info(), "vmem_capacity_bytes", 0)) or None
    except Exception:
        vmem_phys = None
    if vmem_phys is None:
        vmem_phys = (64 << 20) if "v7" in kind else (128 << 20)
    # Request ~3/4 of physical VMEM as the scoped limit (cap at 100 MiB).
    vmem_limit = min(vmem_phys * 3 // 4, 100 << 20)
    if "v5" in kind:
        budget = 6 << 20
    elif "v7" in kind:
        budget = 12 << 20
    else:  # v6e and unknown
        budget = 8 << 20
    # Keep the double-buffered footprint (~2.3x the spg tile) well under the limit.
    budget = min(budget, vmem_limit // 3)
    return int(budget), int(vmem_limit)


def _pick_h_tile(h, n, C, W, scale, itemsize, budget_bytes, min_steps=8):
    """Largest 8-aligned h_tile whose spg tile fits the budget, with enough grid steps."""
    bytes_per_row = C * scale * W * itemsize          # spg bytes per low-res H row
    max_rows = max(1, budget_bytes // bytes_per_row)
    h_tile = min(h, int(max_rows))
    if h >= 8:
        h_tile = max(8, (h_tile // 8) * 8)            # 8-sublane aligned
        # Enough steps to feed both v7x TensorCores and keep the pipeline primed.
        target_nh = min(pl.cdiv(h, 8), max(2, pl.cdiv(min_steps, max(n, 1))))
        while h_tile > 8 and pl.cdiv(h, h_tile) < target_nh:
            h_tile -= 8
    else:
        h_tile = h                                    # full (small) H dim is always legal
    return h_tile


def stereonet_post_process_plus(modelouts, maxdisp=192, low_max_stride=8, h_tile=None):
    """Eval-mode forward pass of StereoNetPostProcessPlus.

    modelouts: [disp_low (optional), disp_low_unfold, spg]  (NCHW)
    returns:   (N, H, W) disparity map, H = h*low_max_stride, W = w*low_max_stride
    """
    disp_low_unfold = modelouts[-2]
    spg = modelouts[-1]

    N, C, h, w = disp_low_unfold.shape
    Ns, Cs, H, W = spg.shape
    s = int(low_max_stride)
    assert N == Ns and C == Cs
    assert H == h * s and W == w * s

    budget_bytes, vmem_limit = _generation_budgets()
    if h_tile is None:
        h_tile = _pick_h_tile(h, N, C, W, s, 4, budget_bytes)
    assert 0 < h_tile <= h
    assert h_tile % 8 == 0 or h_tile == h, "h_tile must be 8-aligned or the full H"
    n_h = pl.cdiv(h, h_tile)

    kernel = functools.partial(_post_process_kernel, scale=s, maxdisp=float(maxdisp))

    return pl.pallas_call(
        kernel,
        out_shape=jax.ShapeDtypeStruct((N, H, W), spg.dtype),
        grid_spec=pltpu.PrefetchScalarGridSpec(
            num_scalar_prefetch=0,
            grid=(N, n_h),
            in_specs=[
                pl.BlockSpec((1, C, h_tile, w), lambda n, i: (n, 0, i, 0)),
                pl.BlockSpec((1, C, h_tile * s, W), lambda n, i: (n, 0, i, 0)),
            ],
            out_specs=pl.BlockSpec((1, h_tile * s, W), lambda n, i: (n, i, 0)),
        ),
        compiler_params=pltpu.CompilerParams(
            dimension_semantics=("parallel", "parallel"),
            vmem_limit_bytes=vmem_limit,
        ),
    )(disp_low_unfold, spg)


def _reference(disp_low_unfold, spg, maxdisp, s):
    up = jnp.repeat(jnp.repeat(disp_low_unfold, s, axis=2), s, axis=3)
    return (spg * up).sum(axis=1) * maxdisp


if __name__ == "__main__":
    key = jax.random.PRNGKey(0)
    k1, k2, k3, k4, k5 = jax.random.split(key, 5)

    maxdisp, s = 192, 8

    # --- Test 1: stride-8 low-res map, 9 unfold channels, divisible H -------
    N, C, h, w = 2, 9, 16, 16
    disp_low = jax.random.uniform(k1, (N, 1, h, w), jnp.float32)           # unused in eval path
    disp_low_unfold = jax.random.uniform(k2, (N, C, h, w), jnp.float32)
    spg = jax.nn.softmax(jax.random.normal(k3, (N, C, h * s, w * s), jnp.float32), axis=1)

    out = stereonet_post_process_plus([disp_low, disp_low_unfold, spg],
                                      maxdisp=maxdisp, low_max_stride=s)
    out = jax.block_until_ready(out)
    ref = _reference(disp_low_unfold, spg, maxdisp, s)
    assert out.shape == (N, h * s, w * s), out.shape
    assert jnp.allclose(out, ref, atol=1e-3, rtol=1e-5), float(jnp.abs(out - ref).max())

    # --- Test 2: H not divisible by the 8-aligned tile (exercises cdiv masking) ---
    N2, h2, w2 = 1, 12, 16
    disp_low_unfold2 = jax.random.uniform(k4, (N2, C, h2, w2), jnp.float32)
    spg2 = jax.nn.softmax(jax.random.normal(k5, (N2, C, h2 * s, w2 * s), jnp.float32), axis=1)

    out2 = stereonet_post_process_plus([disp_low_unfold2, spg2],
                                       maxdisp=maxdisp, low_max_stride=s)
    out2 = jax.block_until_ready(out2)
    ref2 = _reference(disp_low_unfold2, spg2, maxdisp, s)
    assert out2.shape == (N2, h2 * s, w2 * s), out2.shape
    assert jnp.allclose(out2, ref2, atol=1e-3, rtol=1e-5), float(jnp.abs(out2 - ref2).max())

    print("KERNEL_OK")
</pallas_src>

<mosaic_0001>
module attributes {stable_mosaic.version = 11 : i64} {
  func.func @_post_process_kernel(%arg0: i32, %arg1: i32, %arg2: memref<1x9x8x16xf32, #tpu.memory_space<vmem>>, %arg3: memref<1x9x64x128xf32, #tpu.memory_space<vmem>>, %arg4: memref<1x64x128xf32, #tpu.memory_space<vmem>>) attributes {dimension_semantics = [#tpu.dimension_semantics<parallel>, #tpu.dimension_semantics<parallel>], iteration_bounds = array<i64: 2, 2>, scalar_prefetch = 0 : i64, scratch_operands = 0 : i64, tpu.core_type = #tpu.core_type<tc>, window_params = [{transform_indices = @transform_0, window_bounds = array<i64: 1, 9, 8, 16>}, {transform_indices = @transform_1, window_bounds = array<i64: 1, 9, 64, 128>}, {transform_indices = @transform_2, window_bounds = array<i64: 1, 64, 128>}]} {
    %0 = tpu.iota {dimensions = array<i32: 0>} : vector<16x128xi32>
    %1 = tpu.iota {dimensions = array<i32: 1>} : vector<16x128xi32>
    %c8_i32 = arith.constant 8 : i32
    %2 = vector.broadcast %c8_i32 : i32 to vector<16x128xi32>
    %3 = arith.muli %0, %2 : vector<16x128xi32>
    %4 = arith.cmpi sge, %1, %3 : vector<16x128xi32>
    %c8_i32_0 = arith.constant 8 : i32
    %5 = vector.broadcast %c8_i32_0 : i32 to vector<16x128xi32>
    %6 = arith.addi %3, %5 : vector<16x128xi32>
    %7 = arith.cmpi slt, %1, %6 : vector<16x128xi32>
    %8 = arith.andi %4, %7 : vector<16x128xi1>
    %cst = arith.constant 1.920000e+02 : f32
    %cst_1 = arith.constant 0.000000e+00 : f32
    %9 = vector.broadcast %cst : f32 to vector<16x128xf32>
    %10 = vector.broadcast %cst_1 : f32 to vector<16x128xf32>
    %11 = arith.select %8, %9, %10 : vector<16x128xi1>, vector<16x128xf32>
    %c0 = arith.constant 0 : index
    %c0_2 = arith.constant 0 : index
    %c0_3 = arith.constant 0 : index
    %c0_4 = arith.constant 0 : index
    %12 = vector.load %arg2[%c0, %c0_2, %c0_3, %c0_4] : memref<1x9x8x16xf32, #tpu.memory_space<vmem>>, vector<1x1x8x16xf32>
    %13 = vector.shape_cast %12 : vector<1x1x8x16xf32> to vector<8x16xf32>
    %cst_5 = arith.constant dense<0.000000e+00> : vector<8x128xf32>
    %14 = tpu.matmul %13, %11, %cst_5 {dimension_numbers = #tpu.dot_dimension_numbers<[1], [0], [0], [1], [0, 0, 1, 1], [], []>, precision = #tpu.contract_precision<fp32>} : vector<8x16xf32>, vector<16x128xf32>, vector<8x128xf32> -> vector<8x128xf32>
    %c0_6 = arith.constant 0 : index
    %c0_7 = arith.constant 0 : index
    %c0_8 = arith.constant 0 : index
    %c0_9 = arith.constant 0 : index
    %15 = vector.load %arg3[%c0_6, %c0_7, %c0_8, %c0_9] : memref<1x9x64x128xf32, #tpu.memory_space<vmem>>, vector<1x1x64x128xf32>
    %16 = vector.shape_cast %15 : vector<1x1x64x128xf32> to vector<64x128xf32>
    %17 = vector.shape_cast %16 : vector<64x128xf32> to vector<8x8x128xf32>
    %18 = vector.shape_cast %14 : vector<8x128xf32> to vector<8x1x128xf32>
    %19 = vector.broadcast %18 : vector<8x1x128xf32> to vector<8x8x128xf32>
    %20 = arith.mulf %17, %19 : vector<8x8x128xf32>
    %c0_10 = arith.constant 0 : index
    %c1 = arith.constant 1 : index
    %c0_11 = arith.constant 0 : index
    %c0_12 = arith.constant 0 : index
    %21 = vector.load %arg2[%c0_10, %c1, %c0_11, %c0_12] : memref<1x9x8x16xf32, #tpu.memory_space<vmem>>, vector<1x1x8x16xf32>
    %22 = vector.shape_cast %21 : vector<1x1x8x16xf32> to vector<8x16xf32>
    %cst_13 = arith.constant dense<0.000000e+00> : vector<8x128xf32>
    %23 = tpu.matmul %22, %11, %cst_13 {dimension_numbers = #tpu.dot_dimension_numbers<[1], [0], [0], [1], [0, 0, 1, 1], [], []>, precision = #tpu.contract_precision<fp32>} : vector<8x16xf32>, vector<16x128xf32>, vector<8x128xf32> -> vector<8x128xf32>
    %c0_14 = arith.constant 0 : index
    %c1_15 = arith.constant 1 : index
    %c0_16 = arith.constant 0 : index
    %c0_17 = arith.constant 0 : index
    %24 = vector.load %arg3[%c0_14, %c1_15, %c0_16, %c0_17] : memref<1x9x64x128xf32, #tpu.memory_space<vmem>>, vector<1x1x64x128xf32>
    %25 = vector.shape_cast %24 : vector<1x1x64x128xf32> to vector<64x128xf32>
    %26 = vector.shape_cast %25 : vector<64x128xf32> to vector<8x8x128xf32>
    %27 = vector.shape_cast %23 : vector<8x128xf32> to vector<8x1x128xf32>
    %28 = vector.broadcast %27 : vector<8x1x128xf32> to vector<8x8x128xf32>
    %29 = arith.mulf %26, %28 : vector<8x8x128xf32>
    %30 = arith.addf %20, %29 : vector<8x8x128xf32>
    %c0_18 = arith.constant 0 : index
    %c2 = arith.constant 2 : index
    %c0_19 = arith.constant 0 : index
    %c0_20 = arith.constant 0 : index
    %31 = vector.load %arg2[%c0_18, %c2, %c0_19, %c0_20] : memref<1x9x8x16xf32, #tpu.memory_space<vmem>>, vector<1x1x8x16xf32>
    %32 = vector.shape_cast %31 : vector<1x1x8x16xf32> to vector<8x16xf32>
    %cst_21 = arith.constant dense<0.000000e+00> : vector<8x128xf32>
    %33 = tpu.matmul %32, %11, %cst_21 {dimension_numbers = #tpu.dot_dimension_numbers<[1], [0], [0], [1], [0, 0, 1, 1], [], []>, precision = #tpu.contract_precision<fp32>} : vector<8x16xf32>, vector<16x128xf32>, vector<8x128xf32> -> vector<8x128xf32>
    %c0_22 = arith.constant 0 : index
    %c2_23 = arith.constant 2 : index
    %c0_24 = arith.constant 0 : index
    %c0_25 = arith.constant 0 : index
    %34 = vector.load %arg3[%c0_22, %c2_23, %c0_24, %c0_25] : memref<1x9x64x128xf32, #tpu.memory_space<vmem>>, vector<1x1x64x128xf32>
    %35 = vector.shape_cast %34 : vector<1x1x64x128xf32> to vector<64x128xf32>
    %36 = vector.shape_cast %35 : vector<64x128xf32> to vector<8x8x128xf32>
    %37 = vector.shape_cast %33 : vector<8x128xf32> to vector<8x1x128xf32>
    %38 = vector.broadcast %37 : vector<8x1x128xf32> to vector<8x8x128xf32>
    %39 = arith.mulf %36, %38 : vector<8x8x128xf32>
    %40 = arith.addf %30, %39 : vector<8x8x128xf32>
    %c0_26 = arith.constant 0 : index
    %c3 = arith.constant 3 : index
    %c0_27 = arith.constant 0 : index
    %c0_28 = arith.constant 0 : index
    %41 = vector.load %arg2[%c0_26, %c3, %c0_27, %c0_28] : memref<1x9x8x16xf32, #tpu.memory_space<vmem>>, vector<1x1x8x16xf32>
    %42 = vector.shape_cast %41 : vector<1x1x8x16xf32> to vector<8x16xf32>
    %cst_29 = arith.constant dense<0.000000e+00> : vector<8x128xf32>
    %43 = tpu.matmul %42, %11, %cst_29 {dimension_numbers = #tpu.dot_dimension_numbers<[1], [0], [0], [1], [0, 0, 1, 1], [], []>, precision = #tpu.contract_precision<fp32>} : vector<8x16xf32>, vector<16x128xf32>, vector<8x128xf32> -> vector<8x128xf32>
    %c0_30 = arith.constant 0 : index
    %c3_31 = arith.constant 3 : index
    %c0_32 = arith.constant 0 : index
    %c0_33 = arith.constant 0 : index
    %44 = vector.load %arg3[%c0_30, %c3_31, %c0_32, %c0_33] : memref<1x9x64x128xf32, #tpu.memory_space<vmem>>, vector<1x1x64x128xf32>
    %45 = vector.shape_cast %44 : vector<1x1x64x128xf32> to vector<64x128xf32>
    %46 = vector.shape_cast %45 : vector<64x128xf32> to vector<8x8x128xf32>
    %47 = vector.shape_cast %43 : vector<8x128xf32> to vector<8x1x128xf32>
    %48 = vector.broadcast %47 : vector<8x1x128xf32> to vector<8x8x128xf32>
    %49 = arith.mulf %46, %48 : vector<8x8x128xf32>
    %50 = arith.addf %40, %49 : vector<8x8x128xf32>
    %c0_34 = arith.constant 0 : index
    %c4 = arith.constant 4 : index
    %c0_35 = arith.constant 0 : index
    %c0_36 = arith.constant 0 : index
    %51 = vector.load %arg2[%c0_34, %c4, %c0_35, %c0_36] : memref<1x9x8x16xf32, #tpu.memory_space<vmem>>, vector<1x1x8x16xf32>
    %52 = vector.shape_cast %51 : vector<1x1x8x16xf32> to vector<8x16xf32>
    %cst_37 = arith.constant dense<0.000000e+00> : vector<8x128xf32>
    %53 = tpu.matmul %52, %11, %cst_37 {dimension_numbers = #tpu.dot_dimension_numbers<[1], [0], [0], [1], [0, 0, 1, 1], [], []>, precision = #tpu.contract_precision<fp32>} : vector<8x16xf32>, vector<16x128xf32>, vector<8x128xf32> -> vector<8x128xf32>
    %c0_38 = arith.constant 0 : index
    %c4_39 = arith.constant 4 : index
    %c0_40 = arith.constant 0 : index
    %c0_41 = arith.constant 0 : index
    %54 = vector.load %arg3[%c0_38, %c4_39, %c0_40, %c0_41] : memref<1x9x64x128xf32, #tpu.memory_space<vmem>>, vector<1x1x64x128xf32>
    %55 = vector.shape_cast %54 : vector<1x1x64x128xf32> to vector<64x128xf32>
    %56 = vector.shape_cast %55 : vector<64x128xf32> to vector<8x8x128xf32>
    %57 = vector.shape_cast %53 : vector<8x128xf32> to vector<8x1x128xf32>
    %58 = vector.broadcast %57 : vector<8x1x128xf32> to vector<8x8x128xf32>
    %59 = arith.mulf %56, %58 : vector<8x8x128xf32>
    %60 = arith.addf %50, %59 : vector<8x8x128xf32>
    %c0_42 = arith.constant 0 : index
    %c5 = arith.constant 5 : index
    %c0_43 = arith.constant 0 : index
    %c0_44 = arith.constant 0 : index
    %61 = vector.load %arg2[%c0_42, %c5, %c0_43, %c0_44] : memref<1x9x8x16xf32, #tpu.memory_space<vmem>>, vector<1x1x8x16xf32>
    %62 = vector.shape_cast %61 : vector<1x1x8x16xf32> to vector<8x16xf32>
    %cst_45 = arith.constant dense<0.000000e+00> : vector<8x128xf32>
    %63 = tpu.matmul %62, %11, %cst_45 {dimension_numbers = #tpu.dot_dimension_numbers<[1], [0], [0], [1], [0, 0, 1, 1], [], []>, precision = #tpu.contract_precision<fp32>} : vector<8x16xf32>, vector<16x128xf32>, vector<8x128xf32> -> vector<8x128xf32>
    %c0_46 = arith.constant 0 : index
    %c5_47 = arith.constant 5 : index
    %c0_48 = arith.constant 0 : index
    %c0_49 = arith.constant 0 : index
    %64 = vector.load %arg3[%c0_46, %c5_47, %c0_48, %c0_49] : memref<1x9x64x128xf32, #tpu.memory_space<vmem>>, vector<1x1x64x128xf32>
    %65 = vector.shape_cast %64 : vector<1x1x64x128xf32> to vector<64x128xf32>
    %66 = vector.shape_cast %65 : vector<64x128xf32> to vector<8x8x128xf32>
    %67 = vector.shape_cast %63 : vector<8x128xf32> to vector<8x1x128xf32>
    %68 = vector.broadcast %67 : vector<8x1x128xf32> to vector<8x8x128xf32>
    %69 = arith.mulf %66, %68 : vector<8x8x128xf32>
    %70 = arith.addf %60, %69 : vector<8x8x128xf32>
    %c0_50 = arith.constant 0 : index
    %c6 = arith.constant 6 : index
    %c0_51 = arith.constant 0 : index
    %c0_52 = arith.constant 0 : index
    %71 = vector.load %arg2[%c0_50, %c6, %c0_51, %c0_52] : memref<1x9x8x16xf32, #tpu.memory_space<vmem>>, vector<1x1x8x16xf32>
    %72 = vector.shape_cast %71 : vector<1x1x8x16xf32> to vector<8x16xf32>
    %cst_53 = arith.constant dense<0.000000e+00> : vector<8x128xf32>
    %73 = tpu.matmul %72, %11, %cst_53 {dimension_numbers = #tpu.dot_dimension_numbers<[1], [0], [0], [1], [0, 0, 1, 1], [], []>, precision = #tpu.contract_precision<fp32>} : vector<8x16xf32>, vector<16x128xf32>, vector<8x128xf32> -> vector<8x128xf32>
    %c0_54 = arith.constant 0 : index
    %c6_55 = arith.constant 6 : index
    %c0_56 = arith.constant 0 : index
    %c0_57 = arith.constant 0 : index
    %74 = vector.load %arg3[%c0_54, %c6_55, %c0_56, %c0_57] : memref<1x9x64x128xf32, #tpu.memory_space<vmem>>, vector<1x1x64x128xf32>
    %75 = vector.shape_cast %74 : vector<1x1x64x128xf32> to vector<64x128xf32>
    %76 = vector.shape_cast %75 : vector<64x128xf32> to vector<8x8x128xf32>
    %77 = vector.shape_cast %73 : vector<8x128xf32> to vector<8x1x128xf32>
    %78 = vector.broadcast %77 : vector<8x1x128xf32> to vector<8x8x128xf32>
    %79 = arith.mulf %76, %78 : vector<8x8x128xf32>
    %80 = arith.addf %70, %79 : vector<8x8x128xf32>
    %c0_58 = arith.constant 0 : index
    %c7 = arith.constant 7 : index
    %c0_59 = arith.constant 0 : index
    %c0_60 = arith.constant 0 : index
    %81 = vector.load %arg2[%c0_58, %c7, %c0_59, %c0_60] : memref<1x9x8x16xf32, #tpu.memory_space<vmem>>, vector<1x1x8x16xf32>
    %82 = vector.shape_cast %81 : vector<1x1x8x16xf32> to vector<8x16xf32>
    %cst_61 = arith.constant dense<0.000000e+00> : vector<8x128xf32>
    %83 = tpu.matmul %82, %11, %cst_61 {dimension_numbers = #tpu.dot_dimension_numbers<[1], [0], [0], [1], [0, 0, 1, 1], [], []>, precision = #tpu.contract_precision<fp32>} : vector<8x16xf32>, vector<16x128xf32>, vector<8x128xf32> -> vector<8x128xf32>
    %c0_62 = arith.constant 0 : index
    %c7_63 = arith.constant 7 : index
    %c0_64 = arith.constant 0 : index
    %c0_65 = arith.constant 0 : index
    %84 = vector.load %arg3[%c0_62, %c7_63, %c0_64, %c0_65] : memref<1x9x64x128xf32, #tpu.memory_space<vmem>>, vector<1x1x64x128xf32>
    %85 = vector.shape_cast %84 : vector<1x1x64x128xf32> to vector<64x128xf32>
    %86 = vector.shape_cast %85 : vector<64x128xf32> to vector<8x8x128xf32>
    %87 = vector.shape_cast %83 : vector<8x128xf32> to vector<8x1x128xf32>
    %88 = vector.broadcast %87 : vector<8x1x128xf32> to vector<8x8x128xf32>
    %89 = arith.mulf %86, %88 : vector<8x8x128xf32>
    %90 = arith.addf %80, %89 : vector<8x8x128xf32>
    %c0_66 = arith.constant 0 : index
    %c8 = arith.constant 8 : index
    %c0_67 = arith.constant 0 : index
    %c0_68 = arith.constant 0 : index
    %91 = vector.load %arg2[%c0_66, %c8, %c0_67, %c0_68] : memref<1x9x8x16xf32, #tpu.memory_space<vmem>>, vector<1x1x8x16xf32>
    %92 = vector.shape_cast %91 : vector<1x1x8x16xf32> to vector<8x16xf32>
    %cst_69 = arith.constant dense<0.000000e+00> : vector<8x128xf32>
    %93 = tpu.matmul %92, %11, %cst_69 {dimension_numbers = #tpu.dot_dimension_numbers<[1], [0], [0], [1], [0, 0, 1, 1], [], []>, precision = #tpu.contract_precision<fp32>} : vector<8x16xf32>, vector<16x128xf32>, vector<8x128xf32> -> vector<8x128xf32>
    %c0_70 = arith.constant 0 : index
    %c8_71 = arith.constant 8 : index
    %c0_72 = arith.constant 0 : index
    %c0_73 = arith.constant 0 : index
    %94 = vector.load %arg3[%c0_70, %c8_71, %c0_72, %c0_73] : memref<1x9x64x128xf32, #tpu.memory_space<vmem>>, vector<1x1x64x128xf32>
    %95 = vector.shape_cast %94 : vector<1x1x64x128xf32> to vector<64x128xf32>
    %96 = vector.shape_cast %95 : vector<64x128xf32> to vector<8x8x128xf32>
    %97 = vector.shape_cast %93 : vector<8x128xf32> to vector<8x1x128xf32>
    %98 = vector.broadcast %97 : vector<8x1x128xf32> to vector<8x8x128xf32>
    %99 = arith.mulf %96, %98 : vector<8x8x128xf32>
    %100 = arith.addf %90, %99 : vector<8x8x128xf32>
    %101 = vector.shape_cast %100 : vector<8x8x128xf32> to vector<64x128xf32>
    %c0_74 = arith.constant 0 : index
    %c0_75 = arith.constant 0 : index
    %c0_76 = arith.constant 0 : index
    %102 = vector.load %arg4[%c0_74, %c0_75, %c0_76] : memref<1x64x128xf32, #tpu.memory_space<vmem>>, vector<1x64x128xf32>
    %103 = vector.shape_cast %102 : vector<1x64x128xf32> to vector<64x128xf32>
    %104 = vector.shape_cast %101 : vector<64x128xf32> to vector<1x64x128xf32>
    tpu.vector_store %arg4[%c0_74, %c0_75, %c0_76], %104 {strides = array<i32>} : memref<1x64x128xf32, #tpu.memory_space<vmem>>, vector<1x64x128xf32>,
    return
  }
  func.func @transform_0(%arg0: i32, %arg1: i32) -> (i32, i32, i32, i32) {
    %c0_i32 = arith.constant 0 : i32
    %c0_i32_0 = arith.constant 0 : i32
    %c0_i32_1 = arith.constant 0 : i32
    return %arg0, %c0_i32, %arg1, %c0_i32_0 : i32, i32, i32, i32
  }
  func.func @transform_1(%arg0: i32, %arg1: i32) -> (i32, i32, i32, i32) {
    %c0_i32 = arith.constant 0 : i32
    %c0_i32_0 = arith.constant 0 : i32
    %c0_i32_1 = arith.constant 0 : i32
    return %arg0, %c0_i32, %arg1, %c0_i32_0 : i32, i32, i32, i32
  }
  func.func @transform_2(%arg0: i32, %arg1: i32) -> (i32, i32, i32) {
    %c0_i32 = arith.constant 0 : i32
    %c0_i32_0 = arith.constant 0 : i32
    return %arg0, %arg1, %c0_i32 : i32, i32, i32
  }
}

</mosaic_0001>

<bundles_post_ra>
// kernel: tpu_custom_call.1
= control target key start
LH: loop header
LB: loop body
LE: loop exit
PB: predicated region body
PF: predicated region fallthrough
CT: control target
= control target key end

     0   :  { %7 = vsyncpa [#allocation3], 0  ;;  %s7385_s0 = inlined_call_operand.hbm [shape: f32[2,9,16,16], index: 0, kind: input, shape index: {}]   ;;  %s7386_s1 = inlined_call_operand.hbm [shape: f32[2,9,128,128], index: 1, kind: input, shape index: {}]   ;;  %s7387_s2 = inlined_call_operand.hbm [shape: f32[2,128,128], index: 2, kind: output, shape index: {}]  }
   0x1   :  { %9 = vsyncpa [#allocation3 + $0x1], 0 }
   0x2   :  { %10 = vsyncpa [#allocation6], 0 }
   0x3   :  { %12 = vsyncpa [#allocation6 + $0x1], 0 }
   0x4   :  { %13 = vsyncpa [#allocation4], 0 }
   0x5   :  { %15 = vsyncpa [#allocation4 + $0x1], 0  ;;  %s6444_s9 = smov 0   ;;  %s6446_s10 = smov 0  }
   0x6   :  { %s6448_s11 = smov 0   ;;  %s6450_s12 = smov 0  }
   0x7   :  { %s6452_s13 = smov 0   ;;  %s6454_s14 = smov 0  }
   0x8   :  { %s6456_s15 = smov 0   ;;  %s6458_s16 = smov 0  }
   0x9 LB: > { %s5500_s17 = sadd.s32 4294967295, %s6411_s16   ;;  %s5501_s18 = sadd.s32 4294967294, %s6411_s16   ;;  %s6411_s16 = sphi %s6458_s16, %s21_s16   ;;  %s6407_s15 = sphi %s6456_s15, %s7408_s15   ;;  %s6403_s14 = sphi %s6454_s14, %s7407_s14   ;;  %s6399_s13 = sphi %s6452_s13, %s7406_s13   ;;  %s6395_s12 = sphi %s6450_s12, %s7405_s12   ;;  %s6391_s11 = sphi %s6448_s11, %s7404_s11   ;;  %s6387_s10 = sphi %s6446_s10, %s7403_s10   ;;  %s6383_s9 = sphi %s6444_s9, %s7402_s9  }
   0xa   : > { %s30_s19 = sadd.s32 1, %s6403_s14  ;;  %s33_s20 = sadd.s32 1, %s6407_s15 }
   0xb   : > { %p31_p0 = scmp.ge.s32.totalorder %s30_s19, 2  ;;  %p49_p1 = scmp.ne.s32.totalorder %s6391_s11, %s6387_s10 }
   0xc   : > { %p50_p2 = scmp.eq.s32.totalorder %s6411_s16, 0  ;;  %p55_p5 = scmp.ne.s32.totalorder %s6387_s10, %s6383_s9 }
   0xd   : > { %s7410_s19 = smov (%p31_p0, %s30_s19), 0  ;;  %s7412_s20 = smov (!%p31_p0, %s33_s20), %s6407_s15 }
   0xe   : > { %7390 = sst [smem:[#allocation14_spill]] %s7410_s19  ;;  %s38_s21 = ssub.s32 %s6403_s14, %s7410_s19 }
   0xf   : > { %p6496_p3 = por %p50_p2, %p49_p1  ;;  %p35_p4 = scmp.ge.s32.totalorder %s7412_s20, 2 }
  0x10   : > { %p56_p6 = scmp.eq.s32.totalorder %s5500_s17, 0  ;;  %p109_p7 = scmp.eq.s32.totalorder %s5500_s17, 3 }
  0x11   : > { %s7414_s20 = smov (%p35_p4, %s7412_s20), 0  ;;  %p115_p10 = scmp.eq.s32.totalorder %s5501_s18, 3 }
  0x12   : > { %7392 = sst [smem:[#allocation15_spill]] %s7414_s20  ;;  %p6504_p8 = por %p56_p6, %p55_p5 }
  0x13   : > { %p6508_p9 = por %p109_p7, %p49_p1  ;;  %s37_s25 = ssub.s32 %s6407_s15, %s7414_s20 }
  0x14   : > { %s39_s26 = sor.u32 %s38_s21, %s37_s25  ;;  %s42_s27 = sadd.s32 1, %s6391_s11 }
  0x15   : > { %p40_p11 = scmp.eq.s32.totalorder %s39_s26, 0  ;;  %p6515_p12 = por %p115_p10, %p55_p5 }
  0x16   : > { %p5503_p13 = scmp.ge.s32.totalorder %s6411_s16, 4 }
  0x17   : > { %s6520_s29 = scalar_select %p40_p11, %s6391_s11, %s42_s27  }
  0x18   : > { %131 = sbr.rel (%p5503_p13) target bundleno = 58 (0x3a), region = 16  ;;  %s6524_s30 = sand.u32 (!%p5503_p13), 1, %s6391_s11  }
  0x19   : > { %s6184_s3 = smul.u32 (!%p5503_p13), 18, %s6407_s15  ;;  %s136_s25 = scalar_lea.sflag (!%p5503_p13), [#allocation3], %s6524_s30 }
  0x1a   : > { %s6183_s4 = smul.u32 (!%p5503_p13), 72, %s6524_s30  ;;  %s6413_s27 = smov (!%p5503_p13), [#allocation2]  }
  0x1b   : > { %s144_s5 = sadd.s32 (!%p5503_p13), %s6403_s14, %s6184_s3  ;;  %s6301_s20 = sshll.u32 (!%p5503_p13), %s6413_s27, 4  ;;  %s6302_s20 = int_to_ptr.vmem [resolvable:$false] %s6301_s20 }
  0x1c   : > { %s5504_s6 = sshll.u32 (!%p5503_p13), %s144_s5, 7  ;;  %s139_s18 = scalar_lea.vmem (!%p5503_p13), [#allocation2], %s6183_s4 }
  0x1d   : > { %s146_s17 = scalar_lea.hbm %s7385_s0, %s5504_s6  ;;  %s147_s21 = sshll.u32 %s139_s18, 4  ;;  %s148_s21 = int_to_ptr.vmem [resolvable:$true] %s147_s21 }
  0x1e   : > { %s6297_s26 = scalar_lea.vmem %s148_s21, 1152  ;;  %s6303_s19 = scalar_lea.vmem %s6302_s20, 2304 }
  0x1f   : > { %p6298_p0 = scmp.ne.s32.totalorder %s148_s21, %s6297_s26  ;;  %p6304_p4 = scmp.lt.s32.totalorder %s148_s21, %s6302_s20 }
  0x20   : > { %p6305_p5 = scmp.lt.s32.totalorder %s6303_s19, %s6297_s26 }
  0x21   : > { %p6299_p1 = pnand %p6298_p0, %p6496_p3 }
  0x22   : > { %p6306_p6 = por %p6305_p5, %p6304_p4 }
  0x23   : > { %p6300_p2 = pneg %p6299_p1 }
  0x25   : > { %p6307_p7 = pnand %p6306_p6, %p6300_p2 }
  0x27   : > { %6310 = shalt.err (!%p6307_p7)
}
  0x28   : > { %s6414_s3 = smov 256   ;;  %s6415_s4 = smov 128  }
  0x29   : > { %s6416_s5 = smov 8  }
  0x2a   : > { %6189 = dma.hbm_to_vmem [thread:$0]  (%p6496_p3), %s146_s17, 1152, %s148_s21, %s136_s25, %s6414_s3, %s6415_s4, %s6416_s5  }
  0x2b   : > { %s6185_s6 = smul.u32 576, %s6524_s30  ;;  %s5505_s7 = sshll.u32 %s6403_s14, 3 }
  0x2c   : > { %s6186_s19 = smul.u32 144, %s6407_s15  ;;  %s6417_s26 = smov 2048  }
  0x2d   : > { %s161_s8 = scalar_lea.vmem [#allocation5], %s6185_s6  ;;  %6191 = sst [smem:[#allocation9]] (%p6496_p3), %s6417_s26 }
  0x2e   : > { %s167_s20 = sadd.s32 %s6186_s19, %s5505_s7  ;;  %s182_s18 = sshll.u32 %s161_s8, 4  ;;  %s183_s18 = int_to_ptr.vmem [resolvable:$true] %s182_s18 }
  0x2f   : > { %s6190_s17 = scalar_select %p6496_p3, [#allocation0], [#allocation10] }
  0x30   : > { %s5506_s25 = sshll.u32 %s167_s20, 7  ;;  %s6418_s27 = smov 1024  }
  0x31   : > { %s174_s21 = sld [smem:[%s6190_s17]]   ;;  %s6419_s3 = smov 8  }
  0x32   : > { %6192 = sst [smem:[#allocation9 + $0x1]] (%p6496_p3), %s6418_s27  ;;  %s6420_s4 = smov 128  }
  0x33   : > { %6193 = sst [smem:[#allocation9 + $0x2]] (%p6496_p3), %s6419_s3  ;;  %s169_s7 = scalar_lea.hbm %s7386_s1, %s5506_s25 }
  0x34   : > { %6194 = sst [smem:[#allocation9 + $0x3]] (%p6496_p3), %s6420_s4  ;;  %s158_s8 = scalar_lea.sflag [#allocation6], %s6524_s30 }
  0x35   : > { %6195 = sst [smem:[#allocation9 + $0x4]] (%p6496_p3), %s6420_s4  ;;  %s6421_s26 = smov 131072  }
  0x36   : > { %6196 = sst [smem:[#allocation9 + $0x5]] (%p6496_p3), %s6419_s3 }
  0x37   : > { %s5507_s19 = sshll.u32 %s174_s21, 26 }
  0x38   : > { %s5508_s20 = sadd.s32 134217728, %s5507_s19 }
  0x39   : > { %6197 = dma.general (%p6496_p3), %s169_s7, 9216, %s183_s18, %s158_s8, %s6421_s26, [#allocation9], %s5508_s20, 0  }
  0x3a PF: > { %p5509_p10 = scmp.ge.s32.totalorder %s6411_s16, 1  ;;  %p203_p11 = scmp.lt.s32.totalorder %s6411_s16, 5 }
  0x3c   : > { %p204_p13 = pnand %p5509_p10, %p203_p11 }
  0x3d   : > { %s6563_s17 = sand.u32 (!%p204_p13), 1, %s6387_s10  }
  0x3e   : > { %207 = sbr.rel (%p204_p13) target bundleno = 472 (0x1d8), region = 28  ;;  %s210_s21 = scalar_lea.sflag (!%p204_p13), [#allocation3], %s6563_s17 }
  0x3f   : > { %s6187_s25 = smul.u32 (!%p204_p13), 72, %s6563_s17 }
  0x41   : > { %s6567_s27 = scalar_lea.vmem (!%p204_p13), [#allocation2], %s6187_s25 }
  0x43   : > { %6370 = dma.done.wait (%p6504_p8), %s210_s21, 1152  }
  0x44   : > { %6372 = vsyncadd (%p6504_p8), %s210_s21, 4294966144  ;;  %s6188_s22 = smul.u32 576, %s6563_s17  ;;  %s219_s30 = scalar_lea.sflag [#allocation6], %s6563_s17 }
  0x46   : > { %s6575_s18 = scalar_lea.vmem [#allocation5], %s6188_s22 }
  0x47   : > { %6374 = dma.done.wait (%p6504_p8), %s219_s30, 9216  }
  0x48   : > { %6376 = vsyncadd (%p6504_p8), %s219_s30, 4294958080  ;;  %v250_v0 = vlaneseq  ;;  %v6422_v1 = vmov 0.0   ;;  %vm6423_vm0 = vmmov 0   ;;  %vm268_vm1 = vcmask 130048   ;;  %v267_v8 = vld [vmem:[%s6567_s27] sm:$0xff]  ;;  %v5517_v14 = vld [vmem:[%s6567_s27 + $0x8] sm:$0xff] }
  0x49   : > { %5805 = vmatprep.subr.mxu0 %v6422_v1  ;;  %5812 = vmatprep.subr.mxu1 %v6422_v1  ;;  %v270_v10 = vsel %vm268_vm1, %v267_v8, 0  ;;  %v6424_v18 = vmov 192.0   ;;  %v828_v23 = vsel %vm268_vm1, %v5517_v14, 0  ;;  %v5532_v35 = vld [vmem:[%s6567_s27 + $0x10] sm:$0xff]  ;;  %v5547_v42 = vld [vmem:[%s6567_s27 + $0x18] sm:$0xff]  ;;  %v5562_v49 = vld [vmem:[%s6567_s27 + $0x20] sm:$0xff] }
  0x4a   : > { %v6583_v2 = vshrl.u32 %v250_v0, 7  ;;  %5809 = vmatprep.mubr.msk.f32.mxu0 %vm6423_vm0, %v6422_v1  ;;  %5816 = vmatprep.mubr.msk.f32.mxu1 %vm6423_vm0, %v6422_v1  ;;  %v254_v4 = vand.u32 127, %v250_v0  ;;  %v337_v12 = vand.u32 4294901760, %v270_v10  ;;  %v6629_v27 = vand.u32 4294901760, %v828_v23  ;;  %v5577_v56 = vld [vmem:[%s6567_s27 + $0x28] sm:$0xff]  ;;  %v5592_v63 = vld [vmem:[%s6567_s27 + $0x30] sm:$0xff] }
  0x4b   : > { %v1395_v36 = vsel %vm268_vm1, %v5532_v35, 0  ;;  %v1962_v43 = vsel %vm268_vm1, %v5547_v42, 0  ;;  %v2529_v50 = vsel %vm268_vm1, %v5562_v49, 0  ;;  %v3096_v57 = vsel %vm268_vm1, %v5577_v56, 0  ;;  %v5607_v8 = vld [vmem:[%s6567_s27 + $0x38] sm:$0xff]  ;;  %s5638_s23 = sshll.u32 %s6395_s12, 3 }
  0x4c   : > { %v252_v3 = vadd.s32 8, %v6583_v2  ;;  %v255_v5 = vmul.u32 8, %v6583_v2  ;;  %v338_v16 = vsub.f32 %v270_v10, %v337_v12  ;;  %v896_v32 = vsub.f32 %v828_v23, %v6629_v27  ;;  %s5639_s3 = sshll.u32 %s6399_s13, 4  ;;  %s5510_s4 = sshll.u32 %s6563_s17, 6 }
  0x4d   : > { %v6679_v38 = vand.u32 4294901760, %v1395_v36  ;;  %v6735_v45 = vand.u32 4294901760, %v1962_v43  ;;  %v6791_v52 = vand.u32 4294901760, %v2529_v50  ;;  %v6847_v59 = vand.u32 4294901760, %v3096_v57  ;;  %s7317_s12 = sadd.s32 %s5639_s3, %s5638_s23  ;;  %s247_s5 = scalar_lea.vmem [#allocation7], %s5510_s4 }
  0x4e   : > { %v256_v6 = vmul.u32 8, %v252_v3  ;;  %vm257_vm2 = vcmp.ge.s32.totalorder %v254_v4, %v255_v5  ;;  %v259_v7 = vadd.s32 8, %v255_v5  ;;  %v339_v20 = vand.u32 4294901760, %v338_v16  ;;  %s5640_s13 = sshll.u32 %s7317_s12, 7  ;;  %s5385_s6 = sshll.u32 %s247_s5, 4  ;;  %s7332_s6 = int_to_ptr.vmem [resolvable:$true] %s5385_s6 }
  0x4f   : > { %v897_v33 = vand.u32 4294901760, %v896_v32  ;;  %v1463_v39 = vsub.f32 %v1395_v36, %v6679_v38  ;;  %v2030_v46 = vsub.f32 %v1962_v43, %v6735_v45  ;;  %v2597_v53 = vsub.f32 %v2529_v50, %v6791_v52  ;;  %s7330_s20 = scalar_lea.hbm %s7387_s2, %s5640_s13  ;;  %s5370_s8 = scalar_lea.sflag [#allocation4], %s6563_s17 }
  0x50   : > { %vm258_vm3 = vcmp.ge.s32.totalorder %v254_v4, %v256_v6  ;;  %v260_v9 = vadd.s32 8, %v256_v6  ;;  %vm261_vm4 = vcmp.lt.s32.totalorder %v254_v4, %v259_v7  ;;  %v340_v24 = vsub.f32 %v338_v16, %v339_v20  ;;  %s6311_s26 = scalar_lea.vmem %s7332_s6, 1024  ;;  %s6426_s25 = smov [#allocation7]  }
  0x51   : > { %vm6593_vm5 = vmand %vm257_vm2, %vm261_vm4  ;;  %v898_v34 = vsub.f32 %v896_v32, %v897_v33  ;;  %v1464_v40 = vand.u32 4294901760, %v1463_v39  ;;  %v2031_v47 = vand.u32 4294901760, %v2030_v46  ;;  %v2598_v54 = vand.u32 4294901760, %v2597_v53  ;;  %p6312_p3 = scmp.ne.s32.totalorder %s7332_s6, %s6311_s26  ;;  %s6315_s21 = sshll.u32 %s6426_s25, 4  ;;  %s6316_s21 = int_to_ptr.vmem [resolvable:$false] %s6315_s21 }
  0x52   : > { %vm262_vm6 = vcmp.lt.s32.totalorder %v254_v4, %v260_v9  ;;  %v265_v13 = vsel %vm6593_vm5, 192.0, %v6422_v1  ;;  %v341_v28 = vand.u32 4294901760, %v340_v24  ;;  %v3164_v60 = vsub.f32 %v3096_v57, %v6847_v59  ;;  %p6318_p1 = scmp.lt.s32.totalorder %s7332_s6, %s6316_s21 }
  0x53   : > { %vm6601_vm7 = vmand %vm258_vm3, %vm262_vm6  ;;  %v6605_v17 = vsub.f32 %v265_v13, %v265_v13  ;;  %v899_v37 = vand.u32 4294901760, %v898_v34  ;;  %v1465_v41 = vsub.f32 %v1463_v39, %v1464_v40  ;;  %v2032_v48 = vsub.f32 %v2030_v46, %v2031_v47  ;;  %p6313_p8 = pnand %p6312_p3, %p6508_p9 }
  0x54   : > { %5806 = vmatpush3.msk.msra.mxu0 %vm6601_vm7, %v6424_v18  ;;  %v266_v19 = vsel %vm6601_vm7, 192.0, %v6422_v1  ;;  %v2599_v55 = vsub.f32 %v2597_v53, %v2598_v54  ;;  %v3165_v61 = vand.u32 4294901760, %v3164_v60  ;;  %v3663_v0 = vsel %vm268_vm1, %v5592_v63, 0 }
  0x55   : > { %5807 = vmatprep.subr.mxu0 %v6422_v1  ;;  %v6614_v21 = vsub.f32 %v266_v19, %v266_v19  ;;  %v6617_v22 = vand.u32 4294901760, %v6605_v17  ;;  %v1466_v44 = vand.u32 4294901760, %v1465_v41  ;;  %v2033_v51 = vand.u32 4294901760, %v2032_v48  ;;  %v5622_v19 = vld [vmem:[%s6567_s27 + $0x40] sm:$0xff]  ;;  %p6314_p0 = pneg %p6313_p8  ;;  %s6317_s27 = scalar_lea.vmem %s6316_s21, 2048 }
  0x56   : > { %5808 = vmatpush3.msk.msra.mxu0 %vm6593_vm5, %v6424_v18  ;;  %v2600_v58 = vand.u32 4294901760, %v2599_v55  ;;  %v3166_v62 = vsub.f32 %v3164_v60, %v3165_v61  ;;  %v6903_v4 = vand.u32 4294901760, %v3663_v0  ;;  %v4230_v9 = vsel %vm268_vm1, %v5607_v8, 0  ;;  %p6319_p2 = scmp.lt.s32.totalorder %s6317_s27, %s6311_s26 }
  0x57   : > { %v6624_v25 = vand.u32 4294901760, %v6614_v21  ;;  %5819 = vmatprep.subr.mxu0 %v6422_v1  ;;  %v384_v26 = vsub.f32 %v6605_v17, %v6617_v22  ;;  %5810 = vmatmul.mubr.f32.vlgmr.msra.gmra.mxu0 %v341_v28 }
  0x58   : > { %5820 = vmatpush3.msra.mxu0 %v6614_v21  ;;  %5823 = vmatprep.mubr.msk.f32.mxu0 %vm6423_vm0, %v6422_v1  ;;  %v3167_v3 = vand.u32 4294901760, %v3166_v62  ;;  %v3731_v5 = vsub.f32 %v3663_v0, %v6903_v4  ;;  %p6320_p4 = por %p6319_p2, %p6318_p1 }
  0x59   : > { %v378_v29 = vsub.f32 %v6614_v21, %v6624_v25  ;;  %v6635_v31 = vand.u32 4294901760, %v384_v26  ;;  %5821 = vmatprep.subr.mxu0 %v6422_v1 }
  0x5a   : > { %5822 = vmatpush3.msra.mxu0 %v6605_v17  ;;  %v3732_v6 = vand.u32 4294901760, %v3731_v5  ;;  %p6321_p5 = pnand %p6320_p4, %p6314_p0 }
  0x5b   : > { %v6633_v30 = vand.u32 4294901760, %v378_v29  ;;  %5824 = vmatmul.mubr.f32.vlgmr.msra.gmra.mxu0 %v338_v16  ;;  %5833 = vmatprep.subr.mxu0 %v6422_v1 }
  0x5c   : > { %5834 = vmatpush3.msra.mxu0 %v6624_v25  ;;  %5837 = vmatprep.mubr.msk.f32.mxu0 %vm6423_vm0, %v6422_v1  ;;  %v3733_v7 = vsub.f32 %v3731_v5, %v3732_v6 }
  0x5d   : > { %5813 = vmatpush3.msra.mxu1 %v6633_v30  ;;  %5835 = vmatprep.subr.mxu0 %v6422_v1 }
  0x5e   : > { %5814 = vmatprep.subr.mxu1 %v6422_v1  ;;  %5836 = vmatpush3.msra.mxu0 %v6617_v22  ;;  %v3734_v10 = vand.u32 4294901760, %v3733_v7 }
  0x5f   : > { %5815 = vmatpush3.msra.mxu1 %v6635_v31  ;;  %5838 = vmatmul.mubr.f32.vlgmr.msra.gmra.mxu0 %v337_v12 }
  0x60   : > { %5817 = vmatmul.mubr.f32.vlgmr.msra.gmra.mxu1 %v337_v12  ;;  %5826 = vmatprep.subr.mxu1 %v6422_v1 }
  0x61   : > { %5827 = vmatpush3.msk.msra.mxu1 %vm6601_vm7, %v6424_v18  ;;  %5830 = vmatprep.mubr.msk.f32.mxu1 %vm6423_vm0, %v6422_v1 }
  0x62   : > { %5828 = vmatprep.subr.mxu1 %v6422_v1  ;;  %5847 = vmatprep.subr.mxu0 %v6422_v1 }
  0x63   : > { %5829 = vmatpush3.msk.msra.mxu1 %vm6593_vm5, %v6424_v18  ;;  %5848 = vmatpush3.msk.msra.mxu0 %vm6601_vm7, %v6424_v18 }
  0x64   : > { %5831 = vmatmul.mubr.f32.vlgmr.msra.gmra.mxu1 %v339_v20  ;;  %5840 = vmatprep.subr.mxu1 %v6422_v1  ;;  %v4797_v20 = vsel %vm268_vm1, %v5622_v19, 0 }
  0x65   : > { %5841 = vmatpush3.msk.msra.mxu1 %vm6601_vm7, %v6424_v18  ;;  %5844 = vmatprep.mubr.msk.f32.mxu1 %vm6423_vm0, %v6422_v1  ;;  %v7015_v24 = vand.u32 4294901760, %v4797_v20 }
  0x66   : > { %5842 = vmatprep.subr.mxu1 %v6422_v1  ;;  %5849 = vmatprep.subr.mxu0 %v6422_v1 }
  0x67   : > { %5843 = vmatpush3.msk.msra.mxu1 %vm6593_vm5, %v6424_v18  ;;  %5850 = vmatpush3.msk.msra.mxu0 %vm6593_vm5, %v6424_v18  ;;  %v4865_v26 = vsub.f32 %v4797_v20, %v7015_v24 }
  0x68   : > { %5845 = vmatmul.mubr.f32.vlgmr.msra.gmra.mxu1 %v337_v12  ;;  %5851 = vmatprep.mubr.msk.f32.mxu0 %vm6423_vm0, %v6422_v1  ;;  %v6959_v12 = vand.u32 4294901760, %v4230_v9 }
  0x69   : > { %5854 = vmatprep.subr.mxu1 %v6422_v1  ;;  %5852 = vmatmul.mubr.f32.vlgmr.msra.gmra.mxu0 %v899_v37 }
  0x6a   : > { %5855 = vmatpush3.msra.mxu1 %v6633_v30  ;;  %5861 = vmatprep.subr.mxu0 %v6422_v1  ;;  %v4298_v13 = vsub.f32 %v4230_v9, %v6959_v12 }
  0x6b   : > { %5856 = vmatprep.subr.mxu1 %v6422_v1  ;;  %5862 = vmatpush3.msra.mxu0 %v6614_v21 }
  0x6c   : > { %5857 = vmatpush3.msra.mxu1 %v6635_v31  ;;  %5858 = vmatprep.mubr.msk.f32.mxu1 %vm6423_vm0, %v6422_v1  ;;  %v4299_v14 = vand.u32 4294901760, %v4298_v13 }
  0x6d   : > { %5863 = vmatprep.subr.mxu0 %v6422_v1  ;;  %5859 = vmatmul.mubr.f32.vlgmr.msra.gmra.mxu1 %v6629_v27 }
  0x6e   : > { %5864 = vmatpush3.msra.mxu0 %v6605_v17  ;;  %5865 = vmatprep.mubr.msk.f32.mxu0 %vm6423_vm0, %v6422_v1  ;;  %v4300_v16 = vsub.f32 %v4298_v13, %v4299_v14 }
  0x6f   : > { %5868 = vmatprep.subr.mxu1 %v6422_v1  ;;  %5866 = vmatmul.mubr.f32.vlgmr.msra.gmra.mxu0 %v896_v32 }
  0x70   : > { %5869 = vmatpush3.msk.msra.mxu1 %vm6601_vm7, %v6424_v18  ;;  %5875 = vmatprep.subr.mxu0 %v6422_v1  ;;  %v4301_v23 = vand.u32 4294901760, %v4300_v16 }
  0x71   : > { %5870 = vmatprep.subr.mxu1 %v6422_v1  ;;  %5876 = vmatpush3.msra.mxu0 %v6624_v25 }
  0x72   : > { %5871 = vmatpush3.msk.msra.mxu1 %vm6593_vm5, %v6424_v18  ;;  %5872 = vmatprep.mubr.msk.f32.mxu1 %vm6423_vm0, %v6422_v1 }
  0x73   : > { %5877 = vmatprep.subr.mxu0 %v6422_v1  ;;  %5873 = vmatmul.mubr.f32.vlgmr.msra.gmra.mxu1 %v897_v33 }
  0x74   : > { %5878 = vmatpush3.msra.mxu0 %v6617_v22  ;;  %5879 = vmatprep.mubr.msk.f32.mxu0 %vm6423_vm0, %v6422_v1 }
  0x75   : > { %5882 = vmatprep.subr.mxu1 %v6422_v1  ;;  %5880 = vmatmul.mubr.f32.vlgmr.msra.gmra.mxu0 %v6629_v27 }
  0x76   : > { %5883 = vmatpush3.msk.msra.mxu1 %vm6601_vm7, %v6424_v18  ;;  %5889 = vmatprep.subr.mxu0 %v6422_v1 }
  0x77   : > { %5884 = vmatprep.subr.mxu1 %v6422_v1  ;;  %5890 = vmatpush3.msk.msra.mxu0 %vm6601_vm7, %v6424_v18 }
  0x78   : > { %5885 = vmatpush3.msk.msra.mxu1 %vm6593_vm5, %v6424_v18  ;;  %5886 = vmatprep.mubr.msk.f32.mxu1 %vm6423_vm0, %v6422_v1 }
  0x79   : > { %5891 = vmatprep.subr.mxu0 %v6422_v1  ;;  %5887 = vmatmul.mubr.f32.vlgmr.msra.gmra.mxu1 %v6629_v27  ;;  %v4866_v27 = vand.u32 4294901760, %v4865_v26 }
  0x7a   : > { %5892 = vmatpush3.msk.msra.mxu0 %vm6593_vm5, %v6424_v18  ;;  %5893 = vmatprep.mubr.msk.f32.mxu0 %vm6423_vm0, %v6422_v1 }
  0x7b   : > { %5896 = vmatprep.subr.mxu1 %v6422_v1  ;;  %5894 = vmatmul.mubr.f32.vlgmr.msra.gmra.mxu0 %v1466_v44  ;;  %v4867_v28 = vsub.f32 %v4865_v26, %v4866_v27 }
  0x7c   : > { %5897 = vmatpush3.msra.mxu1 %v6633_v30  ;;  %5903 = vmatprep.subr.mxu0 %v6422_v1 }
  0x7d   : > { %5898 = vmatprep.subr.mxu1 %v6422_v1  ;;  %5904 = vmatpush3.msra.mxu0 %v6614_v21  ;;  %v4868_v29 = vand.u32 4294901760, %v4867_v28 }
  0x7e   : > { %5899 = vmatpush3.msra.mxu1 %v6635_v31  ;;  %5900 = vmatprep.mubr.msk.f32.mxu1 %vm6423_vm0, %v6422_v1 }
  0x7f   : > { %5905 = vmatprep.subr.mxu0 %v6422_v1  ;;  %5901 = vmatmul.mubr.f32.vlgmr.msra.gmra.mxu1 %v6679_v38 }
  0x80   : > { %5906 = vmatpush3.msra.mxu0 %v6605_v17  ;;  %5907 = vmatprep.mubr.msk.f32.mxu0 %vm6423_vm0, %v6422_v1 }
  0x81   : > { %5910 = vmatprep.subr.mxu1 %v6422_v1  ;;  %5908 = vmatmul.mubr.f32.vlgmr.msra.gmra.mxu0 %v1463_v39 }
  0x82   : > { %5911 = vmatpush3.msk.msra.mxu1 %vm6601_vm7, %v6424_v18  ;;  %5917 = vmatprep.subr.mxu0 %v6422_v1 }
  0x83   : > { %5912 = vmatprep.subr.mxu1 %v6422_v1  ;;  %5918 = vmatpush3.msra.mxu0 %v6624_v25 }
  0x84   : > { %5913 = vmatpush3.msk.msra.mxu1 %vm6593_vm5, %v6424_v18  ;;  %5914 = vmatprep.mubr.msk.f32.mxu1 %vm6423_vm0, %v6422_v1 }
  0x85   : > { %5919 = vmatprep.subr.mxu0 %v6422_v1  ;;  %5915 = vmatmul.mubr.f32.vlgmr.msra.gmra.mxu1 %v1464_v40 }
  0x86   : > { %5920 = vmatpush3.msra.mxu0 %v6617_v22  ;;  %5921 = vmatprep.mubr.msk.f32.mxu0 %vm6423_vm0, %v6422_v1 }
  0x87   : > { %5924 = vmatprep.subr.mxu1 %v6422_v1  ;;  %5922 = vmatmul.mubr.f32.vlgmr.msra.gmra.mxu0 %v6679_v38 }
  0x88   : > { %5925 = vmatpush3.msk.msra.mxu1 %vm6601_vm7, %v6424_v18  ;;  %5931 = vmatprep.subr.mxu0 %v6422_v1 }
  0x89   : > { %5926 = vmatprep.subr.mxu1 %v6422_v1  ;;  %5932 = vmatpush3.msk.msra.mxu0 %vm6601_vm7, %v6424_v18 }
  0x8a   : > { %5927 = vmatpush3.msk.msra.mxu1 %vm6593_vm5, %v6424_v18  ;;  %5928 = vmatprep.mubr.msk.f32.mxu1 %vm6423_vm0, %v6422_v1 }
  0x8b   : > { %5933 = vmatprep.subr.mxu0 %v6422_v1  ;;  %5929 = vmatmul.mubr.f32.vlgmr.msra.gmra.mxu1 %v6679_v38 }
  0x8c   : > { %5934 = vmatpush3.msk.msra.mxu0 %vm6593_vm5, %v6424_v18  ;;  %5935 = vmatprep.mubr.msk.f32.mxu0 %vm6423_vm0, %v6422_v1 }
  0x8d   : > { %5938 = vmatprep.subr.mxu1 %v6422_v1  ;;  %5936 = vmatmul.mubr.f32.vlgmr.msra.gmra.mxu0 %v2033_v51 }
  0x8e   : > { %5939 = vmatpush3.msra.mxu1 %v6633_v30  ;;  %5945 = vmatprep.subr.mxu0 %v6422_v1 }
  0x8f   : > { %5940 = vmatprep.subr.mxu1 %v6422_v1  ;;  %5946 = vmatpush3.msra.mxu0 %v6614_v21 }
  0x90   : > { %5941 = vmatpush3.msra.mxu1 %v6635_v31  ;;  %5942 = vmatprep.mubr.msk.f32.mxu1 %vm6423_vm0, %v6422_v1 }
  0x91   : > { %5947 = vmatprep.subr.mxu0 %v6422_v1  ;;  %5943 = vmatmul.mubr.f32.vlgmr.msra.gmra.mxu1 %v6735_v45 }
  0x92   : > { %5948 = vmatpush3.msra.mxu0 %v6605_v17  ;;  %5949 = vmatprep.mubr.msk.f32.mxu0 %vm6423_vm0, %v6422_v1 }
  0x93   : > { %5952 = vmatprep.subr.mxu1 %v6422_v1  ;;  %5950 = vmatmul.mubr.f32.vlgmr.msra.gmra.mxu0 %v2030_v46  ;;  %v7120_v46 = vsub.s32 0, %v6583_v2 }
  0x94   : > { %5953 = vmatpush3.msk.msra.mxu1 %vm6601_vm7, %v6424_v18  ;;  %5959 = vmatprep.subr.mxu0 %v6422_v1 }
  0x95   : > { %5954 = vmatprep.subr.mxu1 %v6422_v1  ;;  %5960 = vmatpush3.msra.mxu0 %v6624_v25 }
  0x96   : > { %5955 = vmatpush3.msk.msra.mxu1 %vm6593_vm5, %v6424_v18  ;;  %5956 = vmatprep.mubr.msk.f32.mxu1 %vm6423_vm0, %v6422_v1 }
  0x97   : > { %5961 = vmatprep.subr.mxu0 %v6422_v1  ;;  %5957 = vmatmul.mubr.f32.vlgmr.msra.gmra.mxu1 %v2031_v47 }
  0x98   : > { %5962 = vmatpush3.msra.mxu0 %v6617_v22  ;;  %5963 = vmatprep.mubr.msk.f32.mxu0 %vm6423_vm0, %v6422_v1 }
  0x99   : > { %5966 = vmatprep.subr.mxu1 %v6422_v1  ;;  %5964 = vmatmul.mubr.f32.vlgmr.msra.gmra.mxu0 %v6735_v45 }
  0x9a   : > { %5967 = vmatpush3.msk.msra.mxu1 %vm6601_vm7, %v6424_v18  ;;  %5973 = vmatprep.subr.mxu0 %v6422_v1 }
  0x9b   : > { %5968 = vmatprep.subr.mxu1 %v6422_v1  ;;  %5974 = vmatpush3.msk.msra.mxu0 %vm6601_vm7, %v6424_v18 }
  0x9c   : > { %5969 = vmatpush3.msk.msra.mxu1 %vm6593_vm5, %v6424_v18  ;;  %5970 = vmatprep.mubr.msk.f32.mxu1 %vm6423_vm0, %v6422_v1 }
  0x9d   : > { %5975 = vmatprep.subr.mxu0 %v6422_v1  ;;  %5971 = vmatmul.mubr.f32.vlgmr.msra.gmra.mxu1 %v6735_v45 }
  0x9e   : > { %5976 = vmatpush3.msk.msra.mxu0 %vm6593_vm5, %v6424_v18  ;;  %5977 = vmatprep.mubr.msk.f32.mxu0 %vm6423_vm0, %v6422_v1 }
  0x9f   : > { %5980 = vmatprep.subr.mxu1 %v6422_v1  ;;  %5978 = vmatmul.mubr.f32.vlgmr.msra.gmra.mxu0 %v2600_v58 }
  0xa0   : > { %5981 = vmatpush3.msra.mxu1 %v6633_v30  ;;  %5987 = vmatprep.subr.mxu0 %v6422_v1 }
  0xa1   : > { %5982 = vmatprep.subr.mxu1 %v6422_v1  ;;  %5988 = vmatpush3.msra.mxu0 %v6614_v21 }
  0xa2   : > { %5983 = vmatpush3.msra.mxu1 %v6635_v31  ;;  %5984 = vmatprep.mubr.msk.f32.mxu1 %vm6423_vm0, %v6422_v1 }
  0xa3   : > { %5989 = vmatprep.subr.mxu0 %v6422_v1  ;;  %5985 = vmatmul.mubr.f32.vlgmr.msra.gmra.mxu1 %v6791_v52 }
  0xa4   : > { %5990 = vmatpush3.msra.mxu0 %v6605_v17  ;;  %5991 = vmatprep.mubr.msk.f32.mxu0 %vm6423_vm0, %v6422_v1 }
  0xa5   : > { %5994 = vmatprep.subr.mxu1 %v6422_v1  ;;  %5992 = vmatmul.mubr.f32.vlgmr.msra.gmra.mxu0 %v2597_v53 }
  0xa6   : > { %5995 = vmatpush3.msk.msra.mxu1 %vm6601_vm7, %v6424_v18  ;;  %6001 = vmatprep.subr.mxu0 %v6422_v1 }
  0xa7   : > { %5996 = vmatprep.subr.mxu1 %v6422_v1  ;;  %6002 = vmatpush3.msra.mxu0 %v6624_v25 }
  0xa8   : > { %5997 = vmatpush3.msk.msra.mxu1 %vm6593_vm5, %v6424_v18  ;;  %5998 = vmatprep.mubr.msk.f32.mxu1 %vm6423_vm0, %v6422_v1 }
  0xa9   : > { %6003 = vmatprep.subr.mxu0 %v6422_v1  ;;  %5999 = vmatmul.mubr.f32.vlgmr.msra.gmra.mxu1 %v2598_v54 }
  0xaa   : > { %6004 = vmatpush3.msra.mxu0 %v6617_v22  ;;  %6005 = vmatprep.mubr.msk.f32.mxu0 %vm6423_vm0, %v6422_v1 }
  0xab   : > { %6008 = vmatprep.subr.mxu1 %v6422_v1  ;;  %6006 = vmatmul.mubr.f32.vlgmr.msra.gmra.mxu0 %v6791_v52 }
  0xac   : > { %6009 = vmatpush3.msk.msra.mxu1 %vm6601_vm7, %v6424_v18  ;;  %6015 = vmatprep.subr.mxu0 %v6422_v1 }
  0xad   : > { %6010 = vmatprep.subr.mxu1 %v6422_v1  ;;  %6016 = vmatpush3.msk.msra.mxu0 %vm6601_vm7, %v6424_v18 }
  0xae   : > { %6011 = vmatpush3.msk.msra.mxu1 %vm6593_vm5, %v6424_v18  ;;  %6012 = vmatprep.mubr.msk.f32.mxu1 %vm6423_vm0, %v6422_v1 }
  0xaf   : > { %6017 = vmatprep.subr.mxu0 %v6422_v1  ;;  %6013 = vmatmul.mubr.f32.vlgmr.msra.gmra.mxu1 %v6791_v52 }
  0xb0   : > { %6018 = vmatpush3.msk.msra.mxu0 %vm6593_vm5, %v6424_v18  ;;  %6019 = vmatprep.mubr.msk.f32.mxu0 %vm6423_vm0, %v6422_v1 }
  0xb1   : > { %6022 = vmatprep.subr.mxu1 %v6422_v1  ;;  %6020 = vmatmul.mubr.f32.vlgmr.msra.gmra.mxu0 %v3167_v3 }
  0xb2   : > { %6023 = vmatpush3.msra.mxu1 %v6633_v30  ;;  %6029 = vmatprep.subr.mxu0 %v6422_v1 }
  0xb3   : > { %6024 = vmatprep.subr.mxu1 %v6422_v1  ;;  %6030 = vmatpush3.msra.mxu0 %v6614_v21 }
  0xb4   : > { %6025 = vmatpush3.msra.mxu1 %v6635_v31  ;;  %6026 = vmatprep.mubr.msk.f32.mxu1 %vm6423_vm0, %v6422_v1 }
  0xb5   : > { %6031 = vmatprep.subr.mxu0 %v6422_v1  ;;  %6027 = vmatmul.mubr.f32.vlgmr.msra.gmra.mxu1 %v6847_v59 }
  0xb6   : > { %6032 = vmatpush3.msra.mxu0 %v6605_v17  ;;  %6033 = vmatprep.mubr.msk.f32.mxu0 %vm6423_vm0, %v6422_v1 }
  0xb7   : > { %6036 = vmatprep.subr.mxu1 %v6422_v1  ;;  %6034 = vmatmul.mubr.f32.vlgmr.msra.gmra.mxu0 %v3164_v60 }
  0xb8   : > { %6037 = vmatpush3.msk.msra.mxu1 %vm6601_vm7, %v6424_v18  ;;  %6043 = vmatprep.subr.mxu0 %v6422_v1 }
  0xb9   : > { %6038 = vmatprep.subr.mxu1 %v6422_v1  ;;  %6044 = vmatpush3.msra.mxu0 %v6624_v25 }
  0xba   : > { %6039 = vmatpush3.msk.msra.mxu1 %vm6593_vm5, %v6424_v18  ;;  %6040 = vmatprep.mubr.msk.f32.mxu1 %vm6423_vm0, %v6422_v1 }
  0xbb   : > { %6045 = vmatprep.subr.mxu0 %v6422_v1  ;;  %6041 = vmatmul.mubr.f32.vlgmr.msra.gmra.mxu1 %v3165_v61 }
  0xbc   : > { %6046 = vmatpush3.msra.mxu0 %v6617_v22  ;;  %6047 = vmatprep.mubr.msk.f32.mxu0 %vm6423_vm0, %v6422_v1 }
  0xbd   : > { %6050 = vmatprep.subr.mxu1 %v6422_v1  ;;  %6048 = vmatmul.mubr.f32.vlgmr.msra.gmra.mxu0 %v6847_v59 }
  0xbe   : > { %6051 = vmatpush3.msk.msra.mxu1 %vm6601_vm7, %v6424_v18  ;;  %6057 = vmatprep.subr.mxu0 %v6422_v1 }
  0xbf   : > { %6052 = vmatprep.subr.mxu1 %v6422_v1  ;;  %6058 = vmatpush3.msk.msra.mxu0 %vm6601_vm7, %v6424_v18 }
  0xc0   : > { %6053 = vmatpush3.msk.msra.mxu1 %vm6593_vm5, %v6424_v18  ;;  %6054 = vmatprep.mubr.msk.f32.mxu1 %vm6423_vm0, %v6422_v1 }
  0xc1   : > { %6059 = vmatprep.subr.mxu0 %v6422_v1  ;;  %6055 = vmatmul.mubr.f32.vlgmr.msra.gmra.mxu1 %v6847_v59 }
  0xc2   : > { %6060 = vmatpush3.msk.msra.mxu0 %vm6593_vm5, %v6424_v18  ;;  %6061 = vmatprep.mubr.msk.f32.mxu0 %vm6423_vm0, %v6422_v1 }
  0xc3   : > { %6064 = vmatprep.subr.mxu1 %v6422_v1  ;;  %6062 = vmatmul.mubr.f32.vlgmr.msra.gmra.mxu0 %v3734_v10 }
  0xc4   : > { %6065 = vmatpush3.msra.mxu1 %v6633_v30  ;;  %6071 = vmatprep.subr.mxu0 %v6422_v1 }
  0xc5   : > { %6066 = vmatprep.subr.mxu1 %v6422_v1  ;;  %6072 = vmatpush3.msra.mxu0 %v6614_v21 }
  0xc6   : > { %6067 = vmatpush3.msra.mxu1 %v6635_v31  ;;  %6068 = vmatprep.mubr.msk.f32.mxu1 %vm6423_vm0, %v6422_v1 }
  0xc7   : > { %6073 = vmatprep.subr.mxu0 %v6422_v1  ;;  %6069 = vmatmul.mubr.f32.vlgmr.msra.gmra.mxu1 %v6903_v4 }
  0xc8   : > { %6074 = vmatpush3.msra.mxu0 %v6605_v17  ;;  %6075 = vmatprep.mubr.msk.f32.mxu0 %vm6423_vm0, %v6422_v1 }
  0xc9   : > { %6078 = vmatprep.subr.mxu1 %v6422_v1  ;;  %6076 = vmatmul.mubr.f32.vlgmr.msra.gmra.mxu0 %v3731_v5 }
  0xca   : > { %6079 = vmatpush3.msk.msra.mxu1 %vm6601_vm7, %v6424_v18  ;;  %6085 = vmatprep.subr.mxu0 %v6422_v1 }
  0xcb   : > { %6080 = vmatprep.subr.mxu1 %v6422_v1  ;;  %6086 = vmatpush3.msra.mxu0 %v6624_v25 }
  0xcc   : > { %6081 = vmatpush3.msk.msra.mxu1 %vm6593_vm5, %v6424_v18  ;;  %6082 = vmatprep.mubr.msk.f32.mxu1 %vm6423_vm0, %v6422_v1 }
  0xcd   : > { %6087 = vmatprep.subr.mxu0 %v6422_v1  ;;  %6083 = vmatmul.mubr.f32.vlgmr.msra.gmra.mxu1 %v3732_v6 }
  0xce   : > { %6088 = vmatpush3.msra.mxu0 %v6617_v22  ;;  %6089 = vmatprep.mubr.msk.f32.mxu0 %vm6423_vm0, %v6422_v1 }
  0xcf   : > { %6092 = vmatprep.subr.mxu1 %v6422_v1  ;;  %6090 = vmatmul.mubr.f32.vlgmr.msra.gmra.mxu0 %v6903_v4 }
  0xd0   : > { %6093 = vmatpush3.msk.msra.mxu1 %vm6601_vm7, %v6424_v18  ;;  %6099 = vmatprep.subr.mxu0 %v6422_v1 }
  0xd1   : > { %6094 = vmatprep.subr.mxu1 %v6422_v1  ;;  %6100 = vmatpush3.msk.msra.mxu0 %vm6601_vm7, %v6424_v18 }
  0xd2   : > { %6095 = vmatpush3.msk.msra.mxu1 %vm6593_vm5, %v6424_v18  ;;  %6096 = vmatprep.mubr.msk.f32.mxu1 %vm6423_vm0, %v6422_v1 }
  0xd3   : > { %6101 = vmatprep.subr.mxu0 %v6422_v1  ;;  %6097 = vmatmul.mubr.f32.vlgmr.msra.gmra.mxu1 %v6903_v4 }
  0xd4   : > { %6102 = vmatpush3.msk.msra.mxu0 %vm6593_vm5, %v6424_v18  ;;  %6103 = vmatprep.mubr.msk.f32.mxu0 %vm6423_vm0, %v6422_v1 }
  0xd5   : > { %6106 = vmatprep.subr.mxu1 %v6422_v1  ;;  %6104 = vmatmul.mubr.f32.vlgmr.msra.gmra.mxu0 %v4301_v23  ;;  %v719_v23 = vld [vmem:[%s6575_s18] sm:$0xff] }
  0xd6   : > { %6107 = vmatpush3.msra.mxu1 %v6633_v30  ;;  %6113 = vmatprep.subr.mxu0 %v6422_v1 }
  0xd7   : > { %6108 = vmatprep.subr.mxu1 %v6422_v1  ;;  %6114 = vmatpush3.msra.mxu0 %v6614_v21 }
  0xd8   : > { %6109 = vmatpush3.msra.mxu1 %v6635_v31  ;;  %6110 = vmatprep.mubr.msk.f32.mxu1 %vm6423_vm0, %v6422_v1 }
  0xd9   : > { %6115 = vmatprep.subr.mxu0 %v6422_v1  ;;  %6111 = vmatmul.mubr.f32.vlgmr.msra.gmra.mxu1 %v6959_v12 }
  0xda   : > { %6116 = vmatpush3.msra.mxu0 %v6605_v17  ;;  %6117 = vmatprep.mubr.msk.f32.mxu0 %vm6423_vm0, %v6422_v1 }
  0xdb   : > { %6120 = vmatprep.subr.mxu1 %v6422_v1  ;;  %6118 = vmatmul.mubr.f32.vlgmr.msra.gmra.mxu0 %v4298_v13 }
  0xdc   : > { %6121 = vmatpush3.msk.msra.mxu1 %vm6601_vm7, %v6424_v18  ;;  %6127 = vmatprep.subr.mxu0 %v6422_v1 }
  0xdd   : > { %6122 = vmatprep.subr.mxu1 %v6422_v1  ;;  %6128 = vmatpush3.msra.mxu0 %v6624_v25 }
  0xde   : > { %6123 = vmatpush3.msk.msra.mxu1 %vm6593_vm5, %v6424_v18  ;;  %6124 = vmatprep.mubr.msk.f32.mxu1 %vm6423_vm0, %v6422_v1 }
  0xdf   : > { %6129 = vmatprep.subr.mxu0 %v6422_v1  ;;  %6125 = vmatmul.mubr.f32.vlgmr.msra.gmra.mxu1 %v4299_v14 }
  0xe0   : > { %6130 = vmatpush3.msra.mxu0 %v6617_v22  ;;  %6131 = vmatprep.mubr.msk.f32.mxu0 %vm6423_vm0, %v6422_v1 }
  0xe1   : > { %6134 = vmatprep.subr.mxu1 %v6422_v1  ;;  %6132 = vmatmul.mubr.f32.vlgmr.msra.gmra.mxu0 %v6959_v12 }
  0xe2   : > { %6135 = vmatpush3.msk.msra.mxu1 %vm6601_vm7, %v6424_v18  ;;  %6141 = vmatprep.subr.mxu0 %v6422_v1 }
  0xe3   : > { %6136 = vmatprep.subr.mxu1 %v6422_v1  ;;  %6142 = vmatpush3.msk.msra.mxu0 %vm6601_vm7, %v6424_v18 }
  0xe4   : > { %6137 = vmatpush3.msk.msra.mxu1 %vm6593_vm5, %v6424_v18  ;;  %6138 = vmatprep.mubr.msk.f32.mxu1 %vm6423_vm0, %v6422_v1 }
  0xe5   : > { %6143 = vmatprep.subr.mxu0 %v6422_v1  ;;  %6139 = vmatmul.mubr.f32.vlgmr.msra.gmra.mxu1 %v6959_v12 }
  0xe6   : > { %6144 = vmatpush3.msk.msra.mxu0 %vm6593_vm5, %v6424_v18  ;;  %6145 = vmatprep.mubr.msk.f32.mxu0 %vm6423_vm0, %v6422_v1 }
  0xe7   : > { %6148 = vmatprep.subr.mxu1 %v6422_v1  ;;  %6146 = vmatmul.mubr.f32.vlgmr.msra.gmra.mxu0 %v4868_v29 }
  0xe8   : > { %6149 = vmatpush3.msra.mxu1 %v6633_v30  ;;  %6155 = vmatprep.subr.mxu0 %v6422_v1  ;;  %v6425_v30 = vmov 1966171168  }
  0xe9   : > { %6150 = vmatprep.subr.mxu1 %v6422_v1  ;;  %6156 = vmatpush3.msra.mxu0 %v6614_v21 }
  0xea   : > { %6151 = vmatpush3.msra.mxu1 %v6635_v31  ;;  %6152 = vmatprep.mubr.msk.f32.mxu1 %vm6423_vm0, %v6422_v1  ;;  %v730_v31 = vunpack.c.l.s4 %v6425_v30 }
  0xeb   : > { %6157 = vmatprep.subr.mxu0 %v6422_v1  ;;  %6153 = vmatmul.mubr.f32.vlgmr.msra.gmra.mxu1 %v7015_v24 }
  0xec   : > { %6158 = vmatpush3.msra.mxu0 %v6605_v17  ;;  %6159 = vmatprep.mubr.msk.f32.mxu0 %vm6423_vm0, %v6422_v1  ;;  %v731_v36 = vunpack.c.0.s8 %v730_v31 }
  0xed   : > { %6162 = vmatprep.subr.mxu1 %v6422_v1  ;;  %6160 = vmatmul.mubr.f32.vlgmr.msra.gmra.mxu0 %v4865_v26  ;;  %v720_v26 = vld [vmem:[%s6575_s18 + $0x8] sm:$0xff] }
  0xee   : > { %6163 = vmatpush3.msk.msra.mxu1 %vm6601_vm7, %v6424_v18  ;;  %6169 = vmatprep.subr.mxu0 %v6422_v1 }
  0xef   : > { %6164 = vmatprep.subr.mxu1 %v6422_v1  ;;  %6170 = vmatpush3.msra.mxu0 %v6624_v25 }
  0xf0   : > { %6165 = vmatpush3.msk.msra.mxu1 %vm6593_vm5, %v6424_v18  ;;  %6166 = vmatprep.mubr.msk.f32.mxu1 %vm6423_vm0, %v6422_v1 }
  0xf1   : > { %6171 = vmatprep.subr.mxu0 %v6422_v1  ;;  %6167 = vmatmul.mubr.f32.vlgmr.msra.gmra.mxu1 %v4866_v27  ;;  %v721_v27 = vld [vmem:[%s6575_s18 + $0x10] sm:$0xff] }
  0xf2   : > { %6172 = vmatpush3.msra.mxu0 %v6617_v22  ;;  %6173 = vmatprep.mubr.msk.f32.mxu0 %vm6423_vm0, %v6422_v1 }
  0xf3   : > { %6176 = vmatprep.subr.mxu1 %v6422_v1  ;;  %6174 = vmatmul.mubr.f32.vlgmr.msra.gmra.mxu0 %v7015_v24 }
  0xf4   : > { %6177 = vmatpush3.msk.msra.mxu1 %vm6601_vm7, %v6424_v18  ;;  %6180 = vmatprep.mubr.msk.f32.mxu1 %vm6423_vm0, %v6422_v1 }
  0xf5   : > { %6178 = vmatprep.subr.mxu1 %v6422_v1 }
  0xf6   : > { %6179 = vmatpush3.msk.msra.mxu1 %vm6593_vm5, %v6424_v18  ;;  %v7116_v18 = vsub.s32 %v731_v36, %v6583_v2 }
  0xf7   : > { %6181 = vmatmul.mubr.f32.vlgmr.msra.gmra.mxu1 %v7015_v24 }
 0x117   : > { %v343_v17 = vpop.f32.mrf.mxu0 }
 0x119   : > { %v5811_v21 = vpop.f32.mrf.mxu0 }
 0x11a   : > { %v723_v21 = vld [vmem:[%s6575_s18 + $0x20] sm:$0xff] }
 0x11b   : > { %v496_v22 = vpop.f32.mrf.mxu0 }
 0x11d   : > { %v5825_v15 = vpop.f32.mrf.mxu0 }
 0x11e   : > { %v725_v15 = vld [vmem:[%s6575_s18 + $0x30] sm:$0xff] }
 0x11f   : > { %v644_v1 = vpop.f32.mrf.mxu0 }
 0x120   : > { %v422_v25 = vpop.f32.mrf.mxu1 }
 0x121   : > { %v423_v32 = vadd.f32 %v422_v25, %v343_v17  ;;  %v5839_v11 = vpop.f32.mrf.mxu0  ;;  %v722_v17 = vld [vmem:[%s6575_s18 + $0x18] sm:$0xff] }
 0x122   : > { %v5818_v33 = vpop.f32.mrf.mxu1 }
 0x123   : > { %v497_v34 = vadd.f32 %v496_v22, %v423_v32  ;;  %v724_v22 = vld [vmem:[%s6575_s18 + $0x28] sm:$0xff]  ;;  %v726_v33 = vld [vmem:[%s6575_s18 + $0x38] sm:$0xff] }
 0x124   : > { %v569_v35 = vpop.f32.mrf.mxu1 }
 0x125   : > { %v570_v37 = vadd.f32 %v569_v35, %v497_v34 }
 0x126   : > { %v5832_v38 = vpop.f32.mrf.mxu1 }
 0x127   : > { %v645_v39 = vadd.f32 %v644_v1, %v570_v37 }
 0x128   : > { %v715_v40 = vpop.f32.mrf.mxu1 }
 0x129   : > { %v716_v41 = vadd.f32 %v715_v40, %v645_v39  ;;  %v901_v42 = vpop.f32.mrf.mxu0 }
 0x12a   : > { %v5846_v43 = vpop.f32.mrf.mxu1 }
 0x12b   : > { %v728_v44 = vcombine.high %v716_v41, %v716_v41  ;;  %v735_v45 = vrot.slane %v716_v41, %v7116_v18  ;;  %v5853_v47 = vpop.f32.mrf.mxu0  ;;  %v5524_v41 = vld [vmem:[%s6575_s18 + $0x40] sm:$0xff] }
 0x12d   : > { %v742_v48 = vrot.slane %v728_v44, %v7116_v18  ;;  %v743_v49 = vcombine.high %v735_v45, %v735_v45  ;;  %v751_v50 = vrot.slane %v735_v45, %v7116_v18  ;;  %v980_v51 = vpop.f32.mrf.mxu1 }
 0x12e   : > { %v981_v57 = vadd.f32 %v980_v51, %v901_v42 }
 0x12f   : > { %v744_v52 = vcombine.high %v742_v48, %v742_v48  ;;  %v758_v53 = vrot.slane %v742_v48, %v7116_v18  ;;  %v765_v54 = vrot.slane %v743_v49, %v7116_v18  ;;  %v773_v55 = vcombine.high %v751_v50, %v751_v50  ;;  %v1054_v58 = vpop.f32.mrf.mxu0  ;;  %v5860_v59 = vpop.f32.mrf.mxu1 }
 0x130   : > { %v780_v56 = vrot.slane %v751_v50, %v7120_v46  ;;  %v1055_v3 = vadd.f32 %v1054_v58, %v981_v57 }
 0x131   : > { %v772_v2 = vrot.slane %v744_v52, %v7116_v18  ;;  %v774_v60 = vcombine.high %v758_v53, %v758_v53  ;;  %v775_v61 = vcombine.high %v765_v54, %v765_v54  ;;  %v784_v62 = vrot.slane %v765_v54, %v7120_v46  ;;  %v5867_v4 = vpop.f32.mrf.mxu0  ;;  %v5526_v54 = vld [vmem:[%s6575_s18 + $0x50] sm:$0xff] }
 0x132   : > { %v788_v63 = vrot.slane %v773_v55, %v7120_v46  ;;  %v796_v0 = vrot.slane %v758_v53, %v7120_v46  ;;  %v817_v31 = vmul.f32 %v780_v56, %v719_v23  ;;  %v5525_v53 = vld [vmem:[%s6575_s18 + $0x48] sm:$0xff]  ;;  %v5528_v55 = vld [vmem:[%s6575_s18 + $0x60] sm:$0xff] }
 0x133   : > { %v776_v5 = vcombine.high %v772_v2, %v772_v2  ;;  %v792_v6 = vrot.slane %v775_v61, %v7120_v46  ;;  %v800_v7 = vrot.slane %v772_v2, %v7120_v46  ;;  %v804_v8 = vrot.slane %v774_v60, %v7120_v46  ;;  %v1127_v9 = vpop.f32.mrf.mxu1  ;;  %v5527_v2 = vld [vmem:[%s6575_s18 + $0x58] sm:$0xff]  ;;  %v5529_v60 = vld [vmem:[%s6575_s18 + $0x68] sm:$0xff]  ;;  %v5530_v61 = vld [vmem:[%s6575_s18 + $0x70] sm:$0xff] }
 0x134   : > { %v1128_v12 = vadd.f32 %v1127_v9, %v1055_v3  ;;  %v818_v34 = vmul.f32 %v784_v62, %v720_v26  ;;  %v819_v1 = vmul.f32 %v788_v63, %v721_v27  ;;  %v821_v39 = vmul.f32 %v796_v0, %v723_v21  ;;  %v5531_v9 = vld [vmem:[%s6575_s18 + $0x78] sm:$0xff] }
 0x135   : > { %v808_v10 = vrot.slane %v776_v5, %v7120_v46  ;;  %v1202_v13 = vpop.f32.mrf.mxu0  ;;  %v5874_v14 = vpop.f32.mrf.mxu1  ;;  %v820_v38 = vmul.f32 %v792_v6, %v722_v17  ;;  %v822_v11 = vmul.f32 %v800_v7, %v724_v22  ;;  %v823_v47 = vmul.f32 %v804_v8, %v725_v15 }
 0x136   : > { %v1203_v16 = vadd.f32 %v1202_v13, %v1128_v12 }
 0x137   : > { %v5881_v19 = vpop.f32.mrf.mxu0  ;;  %v824_v48 = vmul.f32 %v808_v10, %v726_v33 }
 0x139   : > { %v1273_v20 = vpop.f32.mrf.mxu1 }
 0x13a   : > { %v1274_v24 = vadd.f32 %v1273_v20, %v1203_v16 }
 0x13b   : > { %v1468_v28 = vpop.f32.mrf.mxu0  ;;  %v5888_v29 = vpop.f32.mrf.mxu1 }
 0x13c   : > { %v1287_v25 = vcombine.high %v1274_v24, %v1274_v24  ;;  %v1294_v30 = vrot.slane %v1274_v24, %v7116_v18 }
 0x13d   : > { %v5895_v32 = vpop.f32.mrf.mxu0 }
 0x13e   : > { %v1301_v35 = vrot.slane %v1287_v25, %v7116_v18  ;;  %v1302_v36 = vcombine.high %v1294_v30, %v1294_v30  ;;  %v1310_v37 = vrot.slane %v1294_v30, %v7116_v18 }
 0x13f   : > { %v1547_v40 = vpop.f32.mrf.mxu1 }
 0x140   : > { %v1303_v42 = vcombine.high %v1301_v35, %v1301_v35  ;;  %v1317_v43 = vrot.slane %v1301_v35, %v7116_v18  ;;  %v1324_v44 = vrot.slane %v1302_v36, %v7116_v18  ;;  %v1332_v45 = vcombine.high %v1310_v37, %v1310_v37 }
 0x141   : > { %v1339_v49 = vrot.slane %v1310_v37, %v7120_v46  ;;  %v1548_v50 = vadd.f32 %v1547_v40, %v1468_v28  ;;  %v1621_v51 = vpop.f32.mrf.mxu0  ;;  %v5902_v52 = vpop.f32.mrf.mxu1 }
 0x142   : > { %v1331_v56 = vrot.slane %v1303_v42, %v7116_v18  ;;  %v1333_v57 = vcombine.high %v1317_v43, %v1317_v43  ;;  %v1334_v58 = vcombine.high %v1324_v44, %v1324_v44  ;;  %v1343_v59 = vrot.slane %v1324_v44, %v7120_v46 }
 0x143   : > { %v1347_v62 = vrot.slane %v1332_v45, %v7120_v46  ;;  %v1355_v63 = vrot.slane %v1317_v43, %v7120_v46  ;;  %v1376_v0 = vmul.f32 %v5524_v41, %v1339_v49  ;;  %v1622_v3 = vadd.f32 %v1621_v51, %v1548_v50  ;;  %v5909_v4 = vpop.f32.mrf.mxu0  ;;  %v5539_v43 = vld [vmem:[%s6575_s18 + $0x80] sm:$0xff] }
 0x144   : > { %v1335_v5 = vcombine.high %v1331_v56, %v1331_v56  ;;  %v1351_v6 = vrot.slane %v1334_v58, %v7120_v46  ;;  %v1359_v7 = vrot.slane %v1331_v56, %v7120_v46  ;;  %v1363_v8 = vrot.slane %v1333_v57, %v7120_v46 }
 0x145   : > { %v1377_v10 = vmul.f32 %v5525_v53, %v1343_v59  ;;  %v1378_v12 = vmul.f32 %v5526_v54, %v1347_v62  ;;  %v1380_v13 = vmul.f32 %v5528_v55, %v1355_v63  ;;  %v1384_v14 = vadd.f32 %v1376_v0, %v817_v31  ;;  %v1694_v16 = vpop.f32.mrf.mxu1  ;;  %v5540_v53 = vld [vmem:[%s6575_s18 + $0x88] sm:$0xff]  ;;  %v5541_v54 = vld [vmem:[%s6575_s18 + $0x90] sm:$0xff]  ;;  %v5543_v55 = vld [vmem:[%s6575_s18 + $0xa0] sm:$0xff] }
 0x146   : > { %v1367_v19 = vrot.slane %v1335_v5, %v7120_v46  ;;  %v1379_v20 = vmul.f32 %v5527_v2, %v1351_v6  ;;  %v1381_v23 = vmul.f32 %v5529_v60, %v1359_v7  ;;  %v1382_v24 = vmul.f32 %v5530_v61, %v1363_v8  ;;  %v5542_v2 = vld [vmem:[%s6575_s18 + $0x98] sm:$0xff]  ;;  %v5544_v60 = vld [vmem:[%s6575_s18 + $0xa8] sm:$0xff]  ;;  %v5545_v61 = vld [vmem:[%s6575_s18 + $0xb0] sm:$0xff] }
 0x147   : > { %v1385_v26 = vadd.f32 %v1377_v10, %v818_v34  ;;  %v1386_v27 = vadd.f32 %v1378_v12, %v819_v1  ;;  %v1388_v28 = vadd.f32 %v1380_v13, %v821_v39  ;;  %v1695_v29 = vadd.f32 %v1694_v16, %v1622_v3  ;;  %v1769_v17 = vpop.f32.mrf.mxu0  ;;  %v5916_v21 = vpop.f32.mrf.mxu1 }
 0x148   : > { %v1383_v22 = vmul.f32 %v5531_v9, %v1367_v19  ;;  %v1387_v25 = vadd.f32 %v1379_v20, %v820_v38  ;;  %v1389_v30 = vadd.f32 %v1381_v23, %v822_v11  ;;  %v1390_v32 = vadd.f32 %v1382_v24, %v823_v47  ;;  %v5546_v9 = vld [vmem:[%s6575_s18 + $0xb8] sm:$0xff] }
 0x149   : > { %v1770_v15 = vadd.f32 %v1769_v17, %v1695_v29  ;;  %v5923_v33 = vpop.f32.mrf.mxu0 }
 0x14a   : > { %v1391_v31 = vadd.f32 %v1383_v22, %v824_v48 }
 0x14b   : > { %v1840_v35 = vpop.f32.mrf.mxu1 }
 0x14c   : > { %v1841_v36 = vadd.f32 %v1840_v35, %v1770_v15 }
 0x14d   : > { %v2035_v37 = vpop.f32.mrf.mxu0  ;;  %v5930_v40 = vpop.f32.mrf.mxu1 }
 0x14e   : > { %v1854_v41 = vcombine.high %v1841_v36, %v1841_v36  ;;  %v1861_v34 = vrot.slane %v1841_v36, %v7116_v18 }
 0x14f   : > { %v5937_v1 = vpop.f32.mrf.mxu0 }
 0x150   : > { %v1868_v39 = vrot.slane %v1854_v41, %v7116_v18  ;;  %v1869_v38 = vcombine.high %v1861_v34, %v1861_v34  ;;  %v1877_v11 = vrot.slane %v1861_v34, %v7116_v18 }
 0x151   : > { %v2114_v42 = vpop.f32.mrf.mxu1 }
 0x152   : > { %v1870_v44 = vcombine.high %v1868_v39, %v1868_v39  ;;  %v1884_v45 = vrot.slane %v1868_v39, %v7116_v18  ;;  %v1891_v47 = vrot.slane %v1869_v38, %v7116_v18  ;;  %v1899_v48 = vcombine.high %v1877_v11, %v1877_v11 }
 0x153   : > { %v1906_v49 = vrot.slane %v1877_v11, %v7120_v46  ;;  %v2115_v50 = vadd.f32 %v2114_v42, %v2035_v37  ;;  %v2188_v51 = vpop.f32.mrf.mxu0  ;;  %v5944_v52 = vpop.f32.mrf.mxu1 }
 0x154   : > { %v1898_v56 = vrot.slane %v1870_v44, %v7116_v18  ;;  %v1900_v57 = vcombine.high %v1884_v45, %v1884_v45  ;;  %v1901_v58 = vcombine.high %v1891_v47, %v1891_v47  ;;  %v1910_v59 = vrot.slane %v1891_v47, %v7120_v46  ;;  %v5554_v44 = vld [vmem:[%s6575_s18 + $0xc0] sm:$0xff] }
 0x155   : > { %v1914_v62 = vrot.slane %v1899_v48, %v7120_v46  ;;  %v1922_v63 = vrot.slane %v1884_v45, %v7120_v46  ;;  %v1943_v0 = vmul.f32 %v5539_v43, %v1906_v49  ;;  %v2189_v3 = vadd.f32 %v2188_v51, %v2115_v50  ;;  %v5951_v4 = vpop.f32.mrf.mxu0 }
 0x156   : > { %v1902_v5 = vcombine.high %v1898_v56, %v1898_v56  ;;  %v1918_v6 = vrot.slane %v1901_v58, %v7120_v46  ;;  %v1926_v7 = vrot.slane %v1898_v56, %v7120_v46  ;;  %v1930_v8 = vrot.slane %v1900_v57, %v7120_v46 }
 0x157   : > { %v1944_v10 = vmul.f32 %v5540_v53, %v1910_v59  ;;  %v1945_v12 = vmul.f32 %v5541_v54, %v1914_v62  ;;  %v1947_v13 = vmul.f32 %v5543_v55, %v1922_v63  ;;  %v1951_v16 = vadd.f32 %v1943_v0, %v1384_v14  ;;  %v2261_v19 = vpop.f32.mrf.mxu1  ;;  %v5555_v53 = vld [vmem:[%s6575_s18 + $0xc8] sm:$0xff]  ;;  %v5556_v54 = vld [vmem:[%s6575_s18 + $0xd0] sm:$0xff]  ;;  %v5558_v55 = vld [vmem:[%s6575_s18 + $0xe0] sm:$0xff] }
 0x158   : > { %v1934_v20 = vrot.slane %v1902_v5, %v7120_v46  ;;  %v1946_v23 = vmul.f32 %v5542_v2, %v1918_v6  ;;  %v1948_v24 = vmul.f32 %v5544_v60, %v1926_v7  ;;  %v1949_v29 = vmul.f32 %v5545_v61, %v1930_v8  ;;  %v5557_v2 = vld [vmem:[%s6575_s18 + $0xd8] sm:$0xff]  ;;  %v5559_v60 = vld [vmem:[%s6575_s18 + $0xe8] sm:$0xff]  ;;  %v5560_v61 = vld [vmem:[%s6575_s18 + $0xf0] sm:$0xff] }
 0x159   : > { %v1952_v17 = vadd.f32 %v1944_v10, %v1385_v26  ;;  %v1953_v21 = vadd.f32 %v1945_v12, %v1386_v27  ;;  %v1955_v22 = vadd.f32 %v1947_v13, %v1388_v28  ;;  %v2262_v15 = vadd.f32 %v2261_v19, %v2189_v3  ;;  %v2336_v33 = vpop.f32.mrf.mxu0  ;;  %v5958_v35 = vpop.f32.mrf.mxu1 }
 0x15a   : > { %v1950_v36 = vmul.f32 %v5546_v9, %v1934_v20  ;;  %v1954_v37 = vadd.f32 %v1946_v23, %v1387_v25  ;;  %v1956_v40 = vadd.f32 %v1948_v24, %v1389_v30  ;;  %v1957_v41 = vadd.f32 %v1949_v29, %v1390_v32  ;;  %v5561_v9 = vld [vmem:[%s6575_s18 + $0xf8] sm:$0xff] }
 0x15b   : > { %v2337_v34 = vadd.f32 %v2336_v33, %v2262_v15  ;;  %v5965_v1 = vpop.f32.mrf.mxu0 }
 0x15c   : > { %v1958_v14 = vadd.f32 %v1950_v36, %v1391_v31 }
 0x15d   : > { %v2407_v39 = vpop.f32.mrf.mxu1 }
 0x15e   : > { %v2408_v38 = vadd.f32 %v2407_v39, %v2337_v34 }
 0x15f   : > { %v2602_v11 = vpop.f32.mrf.mxu0  ;;  %v5972_v42 = vpop.f32.mrf.mxu1 }
 0x160   : > { %v2421_v43 = vcombine.high %v2408_v38, %v2408_v38  ;;  %v2428_v26 = vrot.slane %v2408_v38, %v7116_v18 }
 0x161   : > { %v5979_v27 = vpop.f32.mrf.mxu0 }
 0x162   : > { %v2435_v28 = vrot.slane %v2421_v43, %v7116_v18  ;;  %v2436_v25 = vcombine.high %v2428_v26, %v2428_v26  ;;  %v2444_v30 = vrot.slane %v2428_v26, %v7116_v18 }
 0x163   : > { %v2681_v32 = vpop.f32.mrf.mxu1 }
 0x164   : > { %v2437_v31 = vcombine.high %v2435_v28, %v2435_v28  ;;  %v2451_v45 = vrot.slane %v2435_v28, %v7116_v18  ;;  %v2458_v47 = vrot.slane %v2436_v25, %v7116_v18  ;;  %v2466_v48 = vcombine.high %v2444_v30, %v2444_v30 }
 0x165   : > { %v2473_v49 = vrot.slane %v2444_v30, %v7120_v46  ;;  %v2682_v50 = vadd.f32 %v2681_v32, %v2602_v11  ;;  %v2755_v51 = vpop.f32.mrf.mxu0  ;;  %v5986_v52 = vpop.f32.mrf.mxu1 }
 0x166   : > { %v2465_v56 = vrot.slane %v2437_v31, %v7116_v18  ;;  %v2467_v57 = vcombine.high %v2451_v45, %v2451_v45  ;;  %v2468_v58 = vcombine.high %v2458_v47, %v2458_v47  ;;  %v2477_v59 = vrot.slane %v2458_v47, %v7120_v46  ;;  %v5569_v31 = vld [vmem:[%s6575_s18 + $0x100] sm:$0xff] }
 0x167   : > { %v2481_v62 = vrot.slane %v2466_v48, %v7120_v46  ;;  %v2489_v63 = vrot.slane %v2451_v45, %v7120_v46  ;;  %v2510_v0 = vmul.f32 %v5554_v44, %v2473_v49  ;;  %v2756_v3 = vadd.f32 %v2755_v51, %v2682_v50  ;;  %v5993_v4 = vpop.f32.mrf.mxu0 }
 0x168   : > { %v2469_v5 = vcombine.high %v2465_v56, %v2465_v56  ;;  %v2485_v6 = vrot.slane %v2468_v58, %v7120_v46  ;;  %v2493_v7 = vrot.slane %v2465_v56, %v7120_v46  ;;  %v2497_v8 = vrot.slane %v2467_v57, %v7120_v46 }
 0x169   : > { %v2511_v10 = vmul.f32 %v5555_v53, %v2477_v59  ;;  %v2512_v12 = vmul.f32 %v5556_v54, %v2481_v62  ;;  %v2514_v13 = vmul.f32 %v5558_v55, %v2489_v63  ;;  %v2518_v19 = vadd.f32 %v2510_v0, %v1951_v16  ;;  %v2828_v20 = vpop.f32.mrf.mxu1  ;;  %v5570_v53 = vld [vmem:[%s6575_s18 + $0x108] sm:$0xff]  ;;  %v5571_v54 = vld [vmem:[%s6575_s18 + $0x110] sm:$0xff]  ;;  %v5573_v55 = vld [vmem:[%s6575_s18 + $0x120] sm:$0xff] }
 0x16a   : > { %v2501_v23 = vrot.slane %v2469_v5, %v7120_v46  ;;  %v2513_v24 = vmul.f32 %v5557_v2, %v2485_v6  ;;  %v2515_v29 = vmul.f32 %v5559_v60, %v2493_v7  ;;  %v2516_v15 = vmul.f32 %v5560_v61, %v2497_v8  ;;  %v5572_v2 = vld [vmem:[%s6575_s18 + $0x118] sm:$0xff]  ;;  %v5574_v60 = vld [vmem:[%s6575_s18 + $0x128] sm:$0xff]  ;;  %v5575_v61 = vld [vmem:[%s6575_s18 + $0x130] sm:$0xff] }
 0x16b   : > { %v2519_v33 = vadd.f32 %v2511_v10, %v1952_v17  ;;  %v2520_v35 = vadd.f32 %v2512_v12, %v1953_v21  ;;  %v2522_v36 = vadd.f32 %v2514_v13, %v1955_v22  ;;  %v2829_v34 = vadd.f32 %v2828_v20, %v2756_v3  ;;  %v2903_v1 = vpop.f32.mrf.mxu0  ;;  %v6000_v39 = vpop.f32.mrf.mxu1 }
 0x16c   : > { %v2517_v38 = vmul.f32 %v5561_v9, %v2501_v23  ;;  %v2521_v11 = vadd.f32 %v2513_v24, %v1954_v37  ;;  %v2523_v42 = vadd.f32 %v2515_v29, %v1956_v40  ;;  %v2524_v43 = vadd.f32 %v2516_v15, %v1957_v41  ;;  %v5576_v9 = vld [vmem:[%s6575_s18 + $0x138] sm:$0xff] }
 0x16d   : > { %v2904_v26 = vadd.f32 %v2903_v1, %v2829_v34  ;;  %v6007_v27 = vpop.f32.mrf.mxu0 }
 0x16e   : > { %v2525_v16 = vadd.f32 %v2517_v38, %v1958_v14 }
 0x16f   : > { %v2974_v28 = vpop.f32.mrf.mxu1 }
 0x170   : > { %v2975_v25 = vadd.f32 %v2974_v28, %v2904_v26 }
 0x171   : > { %v3169_v30 = vpop.f32.mrf.mxu0  ;;  %v6014_v32 = vpop.f32.mrf.mxu1 }
 0x172   : > { %v2988_v44 = vcombine.high %v2975_v25, %v2975_v25  ;;  %v2995_v17 = vrot.slane %v2975_v25, %v7116_v18 }
 0x173   : > { %v6021_v21 = vpop.f32.mrf.mxu0 }
 0x174   : > { %v3002_v22 = vrot.slane %v2988_v44, %v7116_v18  ;;  %v3003_v37 = vcombine.high %v2995_v17, %v2995_v17  ;;  %v3011_v40 = vrot.slane %v2995_v17, %v7116_v18 }
 0x175   : > { %v3248_v41 = vpop.f32.mrf.mxu1 }
 0x176   : > { %v3004_v14 = vcombine.high %v3002_v22, %v3002_v22  ;;  %v3018_v45 = vrot.slane %v3002_v22, %v7116_v18  ;;  %v3025_v47 = vrot.slane %v3003_v37, %v7116_v18  ;;  %v3033_v48 = vcombine.high %v3011_v40, %v3011_v40 }
 0x177   : > { %v3040_v49 = vrot.slane %v3011_v40, %v7120_v46  ;;  %v3249_v50 = vadd.f32 %v3248_v41, %v3169_v30  ;;  %v3322_v51 = vpop.f32.mrf.mxu0  ;;  %v6028_v52 = vpop.f32.mrf.mxu1 }
 0x178   : > { %v3032_v56 = vrot.slane %v3004_v14, %v7116_v18  ;;  %v3034_v57 = vcombine.high %v3018_v45, %v3018_v45  ;;  %v3035_v58 = vcombine.high %v3025_v47, %v3025_v47  ;;  %v3044_v59 = vrot.slane %v3025_v47, %v7120_v46  ;;  %v5584_v14 = vld [vmem:[%s6575_s18 + $0x140] sm:$0xff] }
 0x179   : > { %v3048_v62 = vrot.slane %v3033_v48, %v7120_v46  ;;  %v3056_v63 = vrot.slane %v3018_v45, %v7120_v46  ;;  %v3077_v0 = vmul.f32 %v5569_v31, %v3040_v49  ;;  %v3323_v3 = vadd.f32 %v3322_v51, %v3249_v50  ;;  %v6035_v4 = vpop.f32.mrf.mxu0 }
 0x17a   : > { %v3036_v5 = vcombine.high %v3032_v56, %v3032_v56  ;;  %v3052_v6 = vrot.slane %v3035_v58, %v7120_v46  ;;  %v3060_v7 = vrot.slane %v3032_v56, %v7120_v46  ;;  %v3064_v8 = vrot.slane %v3034_v57, %v7120_v46 }
 0x17b   : > { %v3078_v10 = vmul.f32 %v5570_v53, %v3044_v59  ;;  %v3079_v12 = vmul.f32 %v5571_v54, %v3048_v62  ;;  %v3081_v13 = vmul.f32 %v5573_v55, %v3056_v63  ;;  %v3085_v20 = vadd.f32 %v3077_v0, %v2518_v19  ;;  %v3395_v23 = vpop.f32.mrf.mxu1  ;;  %v5585_v53 = vld [vmem:[%s6575_s18 + $0x148] sm:$0xff]  ;;  %v5586_v54 = vld [vmem:[%s6575_s18 + $0x150] sm:$0xff]  ;;  %v5588_v55 = vld [vmem:[%s6575_s18 + $0x160] sm:$0xff] }
 0x17c   : > { %v3068_v24 = vrot.slane %v3036_v5, %v7120_v46  ;;  %v3080_v29 = vmul.f32 %v5572_v2, %v3052_v6  ;;  %v3082_v15 = vmul.f32 %v5574_v60, %v3060_v7  ;;  %v3083_v34 = vmul.f32 %v5575_v61, %v3064_v8  ;;  %v5587_v2 = vld [vmem:[%s6575_s18 + $0x158] sm:$0xff]  ;;  %v5589_v60 = vld [vmem:[%s6575_s18 + $0x168] sm:$0xff]  ;;  %v5590_v61 = vld [vmem:[%s6575_s18 + $0x170] sm:$0xff] }
 0x17d   : > { %v3086_v1 = vadd.f32 %v3078_v10, %v2519_v33  ;;  %v3087_v39 = vadd.f32 %v3079_v12, %v2520_v35  ;;  %v3089_v38 = vadd.f32 %v3081_v13, %v2522_v36  ;;  %v3396_v26 = vadd.f32 %v3395_v23, %v3323_v3  ;;  %v3470_v27 = vpop.f32.mrf.mxu0  ;;  %v6042_v28 = vpop.f32.mrf.mxu1 }
 0x17e   : > { %v3084_v25 = vmul.f32 %v5576_v9, %v3068_v24  ;;  %v3088_v30 = vadd.f32 %v3080_v29, %v2521_v11  ;;  %v3090_v32 = vadd.f32 %v3082_v15, %v2523_v42  ;;  %v3091_v44 = vadd.f32 %v3083_v34, %v2524_v43  ;;  %v5591_v9 = vld [vmem:[%s6575_s18 + $0x178] sm:$0xff] }
 0x17f   : > { %v3471_v17 = vadd.f32 %v3470_v27, %v3396_v26  ;;  %v6049_v21 = vpop.f32.mrf.mxu0 }
 0x180   : > { %v3092_v19 = vadd.f32 %v3084_v25, %v2525_v16 }
 0x181   : > { %v3541_v22 = vpop.f32.mrf.mxu1 }
 0x182   : > { %v3542_v37 = vadd.f32 %v3541_v22, %v3471_v17 }
 0x183   : > { %v3736_v40 = vpop.f32.mrf.mxu0  ;;  %v6056_v41 = vpop.f32.mrf.mxu1 }
 0x184   : > { %v3555_v31 = vcombine.high %v3542_v37, %v3542_v37  ;;  %v3562_v33 = vrot.slane %v3542_v37, %v7116_v18 }
 0x185   : > { %v6063_v35 = vpop.f32.mrf.mxu0 }
 0x186   : > { %v3569_v36 = vrot.slane %v3555_v31, %v7116_v18  ;;  %v3570_v11 = vcombine.high %v3562_v33, %v3562_v33  ;;  %v3578_v42 = vrot.slane %v3562_v33, %v7116_v18 }
 0x187   : > { %v3815_v43 = vpop.f32.mrf.mxu1 }
 0x188   : > { %v3571_v16 = vcombine.high %v3569_v36, %v3569_v36  ;;  %v3585_v45 = vrot.slane %v3569_v36, %v7116_v18  ;;  %v3592_v47 = vrot.slane %v3570_v11, %v7116_v18  ;;  %v3600_v48 = vcombine.high %v3578_v42, %v3578_v42 }
 0x189   : > { %v3607_v49 = vrot.slane %v3578_v42, %v7120_v46  ;;  %v3816_v50 = vadd.f32 %v3815_v43, %v3736_v40  ;;  %v3889_v51 = vpop.f32.mrf.mxu0  ;;  %v6070_v52 = vpop.f32.mrf.mxu1 }
 0x18a   : > { %v3599_v56 = vrot.slane %v3571_v16, %v7116_v18  ;;  %v3601_v57 = vcombine.high %v3585_v45, %v3585_v45  ;;  %v3602_v58 = vcombine.high %v3592_v47, %v3592_v47  ;;  %v3611_v59 = vrot.slane %v3592_v47, %v7120_v46  ;;  %v5599_v16 = vld [vmem:[%s6575_s18 + $0x180] sm:$0xff] }
 0x18b   : > { %v3615_v62 = vrot.slane %v3600_v48, %v7120_v46  ;;  %v3623_v63 = vrot.slane %v3585_v45, %v7120_v46  ;;  %v3644_v0 = vmul.f32 %v5584_v14, %v3607_v49  ;;  %v3890_v3 = vadd.f32 %v3889_v51, %v3816_v50  ;;  %v6077_v4 = vpop.f32.mrf.mxu0 }
 0x18c   : > { %v3603_v5 = vcombine.high %v3599_v56, %v3599_v56  ;;  %v3619_v6 = vrot.slane %v3602_v58, %v7120_v46  ;;  %v3627_v7 = vrot.slane %v3599_v56, %v7120_v46  ;;  %v3631_v8 = vrot.slane %v3601_v57, %v7120_v46 }
 0x18d   : > { %v3645_v10 = vmul.f32 %v5585_v53, %v3611_v59  ;;  %v3646_v12 = vmul.f32 %v5586_v54, %v3615_v62  ;;  %v3648_v13 = vmul.f32 %v5588_v55, %v3623_v63  ;;  %v3652_v23 = vadd.f32 %v3644_v0, %v3085_v20  ;;  %v3962_v24 = vpop.f32.mrf.mxu1  ;;  %v5600_v53 = vld [vmem:[%s6575_s18 + $0x188] sm:$0xff]  ;;  %v5601_v54 = vld [vmem:[%s6575_s18 + $0x190] sm:$0xff]  ;;  %v5603_v55 = vld [vmem:[%s6575_s18 + $0x1a0] sm:$0xff] }
 0x18e   : > { %v3635_v29 = vrot.slane %v3603_v5, %v7120_v46  ;;  %v3647_v15 = vmul.f32 %v5587_v2, %v3619_v6  ;;  %v3649_v34 = vmul.f32 %v5589_v60, %v3627_v7  ;;  %v3650_v26 = vmul.f32 %v5590_v61, %v3631_v8  ;;  %v5602_v2 = vld [vmem:[%s6575_s18 + $0x198] sm:$0xff]  ;;  %v5604_v60 = vld [vmem:[%s6575_s18 + $0x1a8] sm:$0xff]  ;;  %v5605_v61 = vld [vmem:[%s6575_s18 + $0x1b0] sm:$0xff] }
 0x18f   : > { %v3653_v27 = vadd.f32 %v3645_v10, %v3086_v1  ;;  %v3654_v28 = vadd.f32 %v3646_v12, %v3087_v39  ;;  %v3656_v25 = vadd.f32 %v3648_v13, %v3089_v38  ;;  %v3963_v17 = vadd.f32 %v3962_v24, %v3890_v3  ;;  %v4037_v21 = vpop.f32.mrf.mxu0  ;;  %v6084_v22 = vpop.f32.mrf.mxu1 }
 0x190   : > { %v3651_v37 = vmul.f32 %v5591_v9, %v3635_v29  ;;  %v3655_v40 = vadd.f32 %v3647_v15, %v3088_v30  ;;  %v3657_v41 = vadd.f32 %v3649_v34, %v3090_v32  ;;  %v3658_v31 = vadd.f32 %v3650_v26, %v3091_v44  ;;  %v5606_v9 = vld [vmem:[%s6575_s18 + $0x1b8] sm:$0xff] }
 0x191   : > { %v4038_v33 = vadd.f32 %v4037_v21, %v3963_v17  ;;  %v6091_v35 = vpop.f32.mrf.mxu0 }
 0x192   : > { %v3659_v20 = vadd.f32 %v3651_v37, %v3092_v19 }
 0x193   : > { %v4108_v36 = vpop.f32.mrf.mxu1 }
 0x194   : > { %v4109_v11 = vadd.f32 %v4108_v36, %v4038_v33 }
 0x195   : > { %v4303_v42 = vpop.f32.mrf.mxu0  ;;  %v6098_v43 = vpop.f32.mrf.mxu1 }
 0x196   : > { %v4122_v14 = vcombine.high %v4109_v11, %v4109_v11  ;;  %v4129_v1 = vrot.slane %v4109_v11, %v7116_v18 }
 0x197   : > { %v6105_v39 = vpop.f32.mrf.mxu0 }
 0x198   : > { %v4136_v38 = vrot.slane %v4122_v14, %v7116_v18  ;;  %v4137_v30 = vcombine.high %v4129_v1, %v4129_v1  ;;  %v4145_v32 = vrot.slane %v4129_v1, %v7116_v18 }
 0x199   : > { %v4382_v44 = vpop.f32.mrf.mxu1 }
 0x19a   : > { %v4138_v19 = vcombine.high %v4136_v38, %v4136_v38  ;;  %v4152_v45 = vrot.slane %v4136_v38, %v7116_v18  ;;  %v4159_v47 = vrot.slane %v4137_v30, %v7116_v18  ;;  %v4167_v48 = vcombine.high %v4145_v32, %v4145_v32 }
 0x19b   : > { %v4174_v49 = vrot.slane %v4145_v32, %v7120_v46  ;;  %v4383_v50 = vadd.f32 %v4382_v44, %v4303_v42  ;;  %v4456_v51 = vpop.f32.mrf.mxu0  ;;  %v6112_v52 = vpop.f32.mrf.mxu1 }
 0x19c   : > { %v4166_v56 = vrot.slane %v4138_v19, %v7116_v18  ;;  %v4168_v57 = vcombine.high %v4152_v45, %v4152_v45  ;;  %v4169_v58 = vcombine.high %v4159_v47, %v4159_v47  ;;  %v4178_v59 = vrot.slane %v4159_v47, %v7120_v46  ;;  %v5614_v19 = vld [vmem:[%s6575_s18 + $0x1c0] sm:$0xff] }
 0x19d   : > { %v4182_v62 = vrot.slane %v4167_v48, %v7120_v46  ;;  %v4190_v63 = vrot.slane %v4152_v45, %v7120_v46  ;;  %v4211_v0 = vmul.f32 %v5599_v16, %v4174_v49  ;;  %v4457_v3 = vadd.f32 %v4456_v51, %v4383_v50  ;;  %v6119_v4 = vpop.f32.mrf.mxu0 }
 0x19e   : > { %v4170_v5 = vcombine.high %v4166_v56, %v4166_v56  ;;  %v4186_v6 = vrot.slane %v4169_v58, %v7120_v46  ;;  %v4194_v7 = vrot.slane %v4166_v56, %v7120_v46  ;;  %v4198_v8 = vrot.slane %v4168_v57, %v7120_v46 }
 0x19f   : > { %v4212_v10 = vmul.f32 %v5600_v53, %v4178_v59  ;;  %v4213_v12 = vmul.f32 %v5601_v54, %v4182_v62  ;;  %v4215_v13 = vmul.f32 %v5603_v55, %v4190_v63  ;;  %v4219_v24 = vadd.f32 %v4211_v0, %v3652_v23  ;;  %v4529_v29 = vpop.f32.mrf.mxu1  ;;  %v5615_v53 = vld [vmem:[%s6575_s18 + $0x1c8] sm:$0xff]  ;;  %v5616_v54 = vld [vmem:[%s6575_s18 + $0x1d0] sm:$0xff]  ;;  %v5618_v55 = vld [vmem:[%s6575_s18 + $0x1e0] sm:$0xff] }
 0x1a0   : > { %v4202_v15 = vrot.slane %v4170_v5, %v7120_v46  ;;  %v4214_v34 = vmul.f32 %v5602_v2, %v4186_v6  ;;  %v4216_v26 = vmul.f32 %v5604_v60, %v4194_v7  ;;  %v4217_v17 = vmul.f32 %v5605_v61, %v4198_v8  ;;  %v5617_v2 = vld [vmem:[%s6575_s18 + $0x1d8] sm:$0xff]  ;;  %v5619_v60 = vld [vmem:[%s6575_s18 + $0x1e8] sm:$0xff]  ;;  %v5620_v61 = vld [vmem:[%s6575_s18 + $0x1f0] sm:$0xff] }
 0x1a1   : > { %v4220_v21 = vadd.f32 %v4212_v10, %v3653_v27  ;;  %v4221_v22 = vadd.f32 %v4213_v12, %v3654_v28  ;;  %v4223_v37 = vadd.f32 %v4215_v13, %v3656_v25  ;;  %v4530_v33 = vadd.f32 %v4529_v29, %v4457_v3  ;;  %v4604_v35 = vpop.f32.mrf.mxu0  ;;  %v6126_v36 = vpop.f32.mrf.mxu1 }
 0x1a2   : > { %v4218_v11 = vmul.f32 %v5606_v9, %v4202_v15  ;;  %v4222_v42 = vadd.f32 %v4214_v34, %v3655_v40  ;;  %v4224_v43 = vadd.f32 %v4216_v26, %v3657_v41  ;;  %v4225_v14 = vadd.f32 %v4217_v17, %v3658_v31  ;;  %v5621_v9 = vld [vmem:[%s6575_s18 + $0x1f8] sm:$0xff] }
 0x1a3   : > { %v4605_v1 = vadd.f32 %v4604_v35, %v4530_v33  ;;  %v6133_v39 = vpop.f32.mrf.mxu0 }
 0x1a4   : > { %v4226_v23 = vadd.f32 %v4218_v11, %v3659_v20 }
 0x1a5   : > { %v4675_v38 = vpop.f32.mrf.mxu1 }
 0x1a6   : > { %v4676_v30 = vadd.f32 %v4675_v38, %v4605_v1 }
 0x1a7   : > { %v4870_v32 = vpop.f32.mrf.mxu0  ;;  %v6140_v44 = vpop.f32.mrf.mxu1 }
 0x1a8   : > { %v4689_v16 = vcombine.high %v4676_v30, %v4676_v30  ;;  %v4696_v27 = vrot.slane %v4676_v30, %v7116_v18 }
 0x1a9   : > { %v6147_v28 = vpop.f32.mrf.mxu0 }
 0x1aa   : > { %v4703_v25 = vrot.slane %v4689_v16, %v7116_v18  ;;  %v4704_v40 = vcombine.high %v4696_v27, %v4696_v27  ;;  %v4712_v41 = vrot.slane %v4696_v27, %v7116_v18 }
 0x1ab   : > { %v4949_v31 = vpop.f32.mrf.mxu1 }
 0x1ac   : > { %v4705_v20 = vcombine.high %v4703_v25, %v4703_v25  ;;  %v4719_v45 = vrot.slane %v4703_v25, %v7116_v18  ;;  %v4726_v47 = vrot.slane %v4704_v40, %v7116_v18  ;;  %v4734_v48 = vcombine.high %v4712_v41, %v4712_v41 }
 0x1ad   : > { %v4741_v49 = vrot.slane %v4712_v41, %v7120_v46  ;;  %v4950_v50 = vadd.f32 %v4949_v31, %v4870_v32  ;;  %v5023_v51 = vpop.f32.mrf.mxu0  ;;  %v6154_v52 = vpop.f32.mrf.mxu1 }
 0x1ae   : > { %v4733_v56 = vrot.slane %v4705_v20, %v7116_v18  ;;  %v4735_v57 = vcombine.high %v4719_v45, %v4719_v45  ;;  %v4736_v58 = vcombine.high %v4726_v47, %v4726_v47  ;;  %v4745_v59 = vrot.slane %v4726_v47, %v7120_v46  ;;  %v5630_v47 = vld [vmem:[%s6575_s18 + $0x208] sm:$0xff] }
 0x1af   : > { %v4749_v62 = vrot.slane %v4734_v48, %v7120_v46  ;;  %v4757_v63 = vrot.slane %v4719_v45, %v7120_v46  ;;  %v4778_v0 = vmul.f32 %v5614_v19, %v4741_v49  ;;  %v5024_v3 = vadd.f32 %v5023_v51, %v4950_v50  ;;  %v6161_v4 = vpop.f32.mrf.mxu0  ;;  %v5631_v48 = vld [vmem:[%s6575_s18 + $0x210] sm:$0xff]  ;;  %v5633_v49 = vld [vmem:[%s6575_s18 + $0x220] sm:$0xff] }
 0x1b0   : > { %v4737_v5 = vcombine.high %v4733_v56, %v4733_v56  ;;  %v4753_v6 = vrot.slane %v4736_v58, %v7120_v46  ;;  %v4761_v7 = vrot.slane %v4733_v56, %v7120_v46  ;;  %v4765_v8 = vrot.slane %v4735_v57, %v7120_v46  ;;  %v5635_v56 = vld [vmem:[%s6575_s18 + $0x230] sm:$0xff] }
 0x1b1   : > { %v4779_v10 = vmul.f32 %v5615_v53, %v4745_v59  ;;  %v4780_v12 = vmul.f32 %v5616_v54, %v4749_v62  ;;  %v4782_v13 = vmul.f32 %v5618_v55, %v4757_v63  ;;  %v4786_v29 = vadd.f32 %v4778_v0, %v4219_v24  ;;  %v5096_v15 = vpop.f32.mrf.mxu1  ;;  %v5632_v54 = vld [vmem:[%s6575_s18 + $0x218] sm:$0xff]  ;;  %v5634_v55 = vld [vmem:[%s6575_s18 + $0x228] sm:$0xff] }
 0x1b2   : > { %v4769_v34 = vrot.slane %v4737_v5, %v7120_v46  ;;  %v4781_v26 = vmul.f32 %v5617_v2, %v4753_v6  ;;  %v4783_v17 = vmul.f32 %v5619_v60, %v4761_v7  ;;  %v4784_v33 = vmul.f32 %v5620_v61, %v4765_v8  ;;  %v5636_v62 = vld [vmem:[%s6575_s18 + $0x238] sm:$0xff] }
 0x1b3   : > { %v4787_v35 = vadd.f32 %v4779_v10, %v4220_v21  ;;  %v4788_v36 = vadd.f32 %v4780_v12, %v4221_v22  ;;  %v4790_v11 = vadd.f32 %v4782_v13, %v4223_v37  ;;  %v5097_v1 = vadd.f32 %v5096_v15, %v5024_v3  ;;  %v5171_v39 = vpop.f32.mrf.mxu0  ;;  %v6168_v38 = vpop.f32.mrf.mxu1 }
 0x1b4   : > { %v4785_v30 = vmul.f32 %v5621_v9, %v4769_v34  ;;  %v4789_v32 = vadd.f32 %v4781_v26, %v4222_v42  ;;  %v4791_v44 = vadd.f32 %v4783_v17, %v4224_v43  ;;  %v4792_v16 = vadd.f32 %v4784_v33, %v4225_v14  ;;  %v5629_v14 = vld [vmem:[%s6575_s18 + $0x200] sm:$0xff] }
 0x1b5   : > { %v5172_v27 = vadd.f32 %v5171_v39, %v5097_v1  ;;  %v6175_v24 = vpop.f32.mrf.mxu0 }
 0x1b6   : > { %v4793_v28 = vadd.f32 %v4785_v30, %v4226_v23 }
 0x1b7   : > { %v5242_v25 = vpop.f32.mrf.mxu1 }
 0x1b8   : > { %v5243_v40 = vadd.f32 %v5242_v25, %v5172_v27 }
 0x1b9   : > { %v6182_v21 = vpop.f32.mrf.mxu1 }
 0x1ba   : > { %v5256_v22 = vcombine.high %v5243_v40, %v5243_v40  ;;  %v5263_v37 = vrot.slane %v5243_v40, %v7116_v18 }
 0x1bc   : > { %v5270_v41 = vrot.slane %v5256_v22, %v7116_v18  ;;  %v5271_v42 = vcombine.high %v5263_v37, %v5263_v37  ;;  %v5279_v43 = vrot.slane %v5263_v37, %v7116_v18 }
 0x1be   : > { %v5272_v31 = vcombine.high %v5270_v41, %v5270_v41  ;;  %v5286_v23 = vrot.slane %v5270_v41, %v7116_v18  ;;  %v5293_v19 = vrot.slane %v5271_v42, %v7116_v18  ;;  %v5301_v20 = vcombine.high %v5279_v43, %v5279_v43 }
 0x1bf   : > { %v5308_v45 = vrot.slane %v5279_v43, %v7120_v46 }
 0x1c0   : > { %v5300_v50 = vrot.slane %v5272_v31, %v7116_v18  ;;  %v5302_v51 = vcombine.high %v5286_v23, %v5286_v23  ;;  %v5303_v52 = vcombine.high %v5293_v19, %v5293_v19  ;;  %v5312_v53 = vrot.slane %v5293_v19, %v7120_v46 }
 0x1c1   : > { %v5316_v57 = vrot.slane %v5301_v20, %v7120_v46  ;;  %v5324_v58 = vrot.slane %v5286_v23, %v7120_v46  ;;  %v5345_v59 = vmul.f32 %v5629_v14, %v5308_v45 }
 0x1c2   : > { %v5304_v2 = vcombine.high %v5300_v50, %v5300_v50  ;;  %v5320_v60 = vrot.slane %v5303_v52, %v7120_v46  ;;  %v5328_v18 = vrot.slane %v5300_v50, %v7120_v46  ;;  %v5332_v61 = vrot.slane %v5302_v51, %v7120_v46 }
 0x1c3   : > { %v5346_v63 = vmul.f32 %v5630_v47, %v5312_v53  ;;  %v5347_v0 = vmul.f32 %v5631_v48, %v5316_v57  ;;  %v5349_v3 = vmul.f32 %v5633_v49, %v5324_v58  ;;  %v5353_v4 = vadd.f32 %v5345_v59, %v4786_v29 }
 0x1c4   : > { %v5336_v5 = vrot.slane %v5304_v2, %v7120_v46  ;;  %v5348_v6 = vmul.f32 %v5632_v54, %v5320_v60  ;;  %v5350_v7 = vmul.f32 %v5634_v55, %v5328_v18  ;;  %v5351_v8 = vmul.f32 %v5635_v56, %v5332_v61 }
 0x1c5   : > { %v5354_v9 = vadd.f32 %v5346_v63, %v4787_v35  ;;  %v5355_v10 = vadd.f32 %v5347_v0, %v4788_v36  ;;  %v5357_v12 = vadd.f32 %v5349_v3, %v4790_v11  ;;  %5361 = vst [vmem:[%s247_s5] sm:$0xff] %v5353_v4 }
 0x1c6   : > { %v5352_v13 = vmul.f32 %v5636_v62, %v5336_v5  ;;  %v5356_v15 = vadd.f32 %v5348_v6, %v4789_v32  ;;  %v5358_v34 = vadd.f32 %v5350_v7, %v4791_v44  ;;  %v5359_v26 = vadd.f32 %v5351_v8, %v4792_v16 }
 0x1c7   : > { %5362 = vst [vmem:[%s247_s5 + $0x8] sm:$0xff] %v5354_v9  ;;  %5363 = vst [vmem:[%s247_s5 + $0x10] sm:$0xff] %v5355_v10 }
 0x1c8   : > { %5365 = vst [vmem:[%s247_s5 + $0x20] sm:$0xff] %v5357_v12  ;;  %v5360_v46 = vadd.f32 %v5352_v13, %v4793_v28  ;;  %5364 = vst [vmem:[%s247_s5 + $0x18] sm:$0xff] %v5356_v15 }
 0x1c9   : > { %5366 = vst [vmem:[%s247_s5 + $0x28] sm:$0xff] %v5358_v34  ;;  %5367 = vst [vmem:[%s247_s5 + $0x30] sm:$0xff] %v5359_v26 }
 0x1ca   : > { %5368 = vst [vmem:[%s247_s5 + $0x38] sm:$0xff] %v5360_v46 }
 0x1cb   : > { %6324 = shalt.err (!%p6321_p5)
}
 0x1cc   : > { %s6325_s22 = scalar_lea.hbm %s7330_s20, 1024  ;;  %s6329_s23 = scalar_lea.hbm %s7387_s2, 4096 }
 0x1cd   : > { %p6326_p6 = scmp.ne.s32.totalorder %s7330_s20, %s6325_s22  ;;  %p6330_p11 = scmp.lt.s32.totalorder %s7330_s20, %s7387_s2 }
 0x1ce   : > { %p6331_p13 = scmp.lt.s32.totalorder %s6329_s23, %s6325_s22 }
 0x1cf   : > { %p6327_p7 = pnand %p6326_p6, %p6508_p9 }
 0x1d0   : > { %p6332_p3 = por %p6331_p13, %p6330_p11 }
 0x1d1   : > { %p6328_p10 = pneg %p6327_p7 }
 0x1d3   : > { %p6333_p8 = pnand %p6332_p3, %p6328_p10 }
 0x1d5   : > { %6336 = shalt.err (!%p6333_p8)
}
 0x1d6   : > { %s6427_s12 = smov 128   ;;  %s6428_s13 = smov 8  }
 0x1d7   : > { %6200 = dma.vmem_to_hbm [thread:$0]  (%p6508_p9), %s7332_s6, 1024, %s7330_s20, %s5370_s8, %s6427_s12, %s6427_s12, %s6428_s13  }
 0x1d8 PF: > { %p6206_p0 = scmp.ge.s32.totalorder %s6411_s16, 2  ;;  %s5400_s5 = sand.u32 1, %s6383_s9  }
 0x1d9   : > { %s5401_s7 = scalar_lea.sflag [#allocation4], %s5400_s5 }
 0x1da   : > { %p6203_p1 = pnand %p6206_p0, %p6515_p12 }
 0x1dc   : > { %p6204_p2 = pneg %p6203_p1 }
 0x1de   : > { %6378 = dma.done.wait (%p6204_p2), %s5401_s7, 1024  }
 0x1df   : > { %6380 = vsyncadd (%p6204_p2), %s5401_s7, 4294966272  ;;  %s21_s16 = sadd.s32 1, %s6411_s16   ;;  %s7400_s24 = sld [smem:[#allocation14_spill]] }
 0x1e0   : > { %p18_p4 = scmp.ge.s32.totalorder %s21_s16, 6   ;;  %s7401_s17 = sld [smem:[#allocation15_spill]] }
 0x1e1   : > { %s7402_s9 = smov %s6387_s10  ;;  %s7403_s10 = smov %s6391_s11 }
 0x1e2   : > { %s7404_s11 = smov %s6520_s29  ;;  %s7405_s12 = smov %s6403_s14 }
 0x1e3   : > { %s7406_s13 = smov %s6407_s15  ;;  %20 = sbr.rel (!%p18_p4) target bundleno = 9 (0x9), region = 107 }
 0x1e5   : > { %s7407_s14 = smov %s7400_s24 }
 0x1e6   : > { %s7408_s15 = smov %s7401_s17 }
 0x1e8   :  { %5406 = vsyncpa [#allocation3], 1 }
 0x1e9   :  { %5408 = vsyncpa [#allocation3 + $0x1], 1 }
 0x1ea   :  { %5409 = vsyncpa [#allocation6], 1 }
 0x1eb   :  { %5411 = vsyncpa [#allocation6 + $0x1], 1 }
 0x1ec   :  { %5412 = vsyncpa [#allocation4], 1 }
 0x1ed   :  { %5414 = vsyncpa [#allocation4 + $0x1], 1 }

</bundles_post_ra>
